<compile_context>
chip_gen: v7x
topology: tpu7x:2x2x1
jax: 0.10.0
libtpu: 0.0.40
codegen_flags: <defaults>
</compile_context>

<pallas_src>
import functools

import jax
import jax.numpy as jnp
from jax.experimental import pallas as pl
from jax.experimental.pallas import tpu as pltpu


def _round_up(n: int, m: int) -> int:
    return ((n + m - 1) // m) * m


def news_encoder_kernel(x_ref, wh_ref, bh_ref, wo_ref, bo_ref, out_ref):
    """x_ref: (TM, P), wh_ref: (L, P, P), bh_ref: (L, 1, P),
    wo_ref: (P, O_pad), bo_ref: (1, O_pad), out_ref: (TM, O_pad)."""
    n_hidden = wh_ref.shape[0]
    mm_dtype = wh_ref.dtype

    h = x_ref[...].astype(jnp.float32)
    for li in range(n_hidden):                                     # static, short loop
        h = jnp.dot(h.astype(mm_dtype), wh_ref[li],
                    preferred_element_type=jnp.float32) + bh_ref[li]   # Linear (MXU) + bias
        h = jnp.maximum(h, 0.0)                                        # ReLU (VPU, f32)
        # BatchNorm1d(eval) folded into the next layer's weights; Dropout = identity.
    out = jnp.dot(h.astype(mm_dtype), wo_ref[...],
                  preferred_element_type=jnp.float32) + bo_ref[...]
    out_ref[...] = out.astype(out_ref.dtype)


def _prepare_params(hidden_params, out_w, out_b, matmul_dtype):
    """Fold eval-mode BatchNorm into the following layer, pad to lane-aligned shapes,
    and pack hidden weights/biases into single stacked arrays."""
    L = len(hidden_params)
    ws = [jnp.asarray(hp[0], jnp.float32) for hp in hidden_params]   # (in, out)
    bs = [jnp.asarray(hp[1], jnp.float32) for hp in hidden_params]
    out_w = jnp.asarray(out_w, jnp.float32)
    out_b = jnp.asarray(out_b, jnp.float32)

    # Fold (s_i, t_i) of layer i into layer i+1 (or the output layer).
    for i in range(L):
        s = jnp.asarray(hidden_params[i][2], jnp.float32)
        t = jnp.asarray(hidden_params[i][3], jnp.float32)
        if i + 1 < L:
            w_next = ws[i + 1]                       # original (unscaled) next weight
            bs[i + 1] = bs[i + 1] + t @ w_next
            ws[i + 1] = s[:, None] * w_next
        else:
            out_b = out_b + t @ out_w
            out_w = s[:, None] * out_w

    d_in = ws[0].shape[0]
    units = [w.shape[1] for w in ws]
    P = max(_round_up(d_in, 128), max(_round_up(u, 128) for u in units))
    O = out_w.shape[1]
    O_pad = _round_up(O, 128)

    def pad2(w, rows, cols):
        return jnp.pad(w, ((0, rows - w.shape[0]), (0, cols - w.shape[1])))

    w_stack = jnp.stack([pad2(w, P, P) for w in ws]).astype(matmul_dtype)       # (L, P, P)
    b_stack = jnp.stack([jnp.pad(b, (0, P - b.shape[0])).reshape(1, P)
                         for b in bs]).astype(jnp.float32)                      # (L, 1, P)
    wo = pad2(out_w, P, O_pad).astype(matmul_dtype)                             # (P, O_pad)
    bo = jnp.pad(out_b, (0, O_pad - O)).reshape(1, O_pad).astype(jnp.float32)   # (1, O_pad)
    return w_stack, b_stack, wo, bo, P, O, O_pad


@functools.partial(jax.jit, static_argnames=("block_rows", "matmul_dtype"))
def _run(x_pad, w_stack, b_stack, wo, bo, *, block_rows, matmul_dtype):
    B_pad, P = x_pad.shape
    O_pad = wo.shape[1]
    grid = (B_pad // block_rows,)
    return pl.pallas_call(
        news_encoder_kernel,
        out_shape=jax.ShapeDtypeStruct((B_pad, O_pad), jnp.float32),
        grid=grid,
        in_specs=[
            pl.BlockSpec((block_rows, P), lambda i: (i, 0)),      # activation tile: pipelined
            pl.BlockSpec(w_stack.shape, lambda i: (0, 0, 0)),     # weights: VMEM-resident
            pl.BlockSpec(b_stack.shape, lambda i: (0, 0, 0)),
            pl.BlockSpec(wo.shape, lambda i: (0, 0)),
            pl.BlockSpec(bo.shape, lambda i: (0, 0)),
        ],
        out_specs=pl.BlockSpec((block_rows, O_pad), lambda i: (i, 0)),
        compiler_params=pltpu.CompilerParams(
            dimension_semantics=("parallel",)),                   # shards across TCs on v7x
    )(x_pad, w_stack, b_stack, wo, bo)


def news_encoder_forward(x, hidden_params, out_w, out_b, *,
                         block_rows=256, matmul_dtype=jnp.bfloat16):
    """hidden_params: list of (W (in,out), b, bn_scale, bn_shift) tuples (f32)."""
    w_stack, b_stack, wo, bo, P, O, _ = _prepare_params(
        hidden_params, out_w, out_b, matmul_dtype)

    B, D = x.shape
    TM = min(block_rows, _round_up(B, 8))          # batch tile (multiple of 8 sublanes)
    B_pad = _round_up(B, TM)
    x_pad = jnp.pad(x.astype(jnp.float32), ((0, B_pad - B), (0, P - D)))

    out = _run(x_pad, w_stack, b_stack, wo, bo,
               block_rows=TM, matmul_dtype=matmul_dtype)
    return out[:B, :O]


def reference_forward(x, hidden_params, out_w, out_b):
    """Pure-JAX f32 reference matching the PyTorch module in eval mode."""
    h = x.astype(jnp.float32)
    for (w, b, s, t) in hidden_params:
        h = jnp.maximum(h @ w + b, 0.0) * s + t     # Linear -> ReLU -> BN(eval); Dropout=id
    return h @ out_w + out_b


if __name__ == "__main__":
    # Hparams consistent with the module (scaled-down):
    #   title_size (= document_vector_dim) = 64, units_per_layer = [128, 128, 128],
    #   head_num = 8, head_dim = 16  ->  output_dim = 128.
    # Batch is 512 so the kernel actually exercises a multi-step parallel grid (TM=256).
    batch = 512
    document_vector_dim = 64
    units_per_layer = [128, 128, 128]
    head_num, head_dim = 8, 16
    output_dim = head_num * head_dim
    bn_eps = 1e-5

    key = jax.random.PRNGKey(0)

    hidden_params = []
    in_units = document_vector_dim
    for units in units_per_layer:
        key, kw, kb, kg, kbeta, km, kv = jax.random.split(key, 7)
        w = jax.random.normal(kw, (in_units, units), jnp.float32) * (1.0 / jnp.sqrt(in_units))
        b = jax.random.normal(kb, (units,), jnp.float32) * 0.01
        gamma = 1.0 + 0.1 * jax.random.normal(kg, (units,), jnp.float32)
        beta = 0.1 * jax.random.normal(kbeta, (units,), jnp.float32)
        running_mean = 0.05 * jax.random.normal(km, (units,), jnp.float32)
        running_var = 1.0 + 0.1 * jax.random.uniform(kv, (units,), jnp.float32)
        # Fold BatchNorm1d (eval mode) into a per-feature affine (s, t).
        s = gamma / jnp.sqrt(running_var + bn_eps)
        t = beta - running_mean * s
        hidden_params.append((w, b, s, t))
        in_units = units

    key, kwo, kbo, kx = jax.random.split(key, 4)
    out_w = jax.random.normal(kwo, (in_units, output_dim), jnp.float32) * (1.0 / jnp.sqrt(in_units))
    out_b = jax.random.normal(kbo, (output_dim,), jnp.float32) * 0.01

    x = jax.random.normal(kx, (batch, document_vector_dim), jnp.float32)

    ref = reference_forward(x, hidden_params, out_w, out_b)

    # 1) f32 matmul path: tight check of the BN-fold / padding / packing logic.
    out_f32 = jax.block_until_ready(
        news_encoder_forward(x, hidden_params, out_w, out_b, matmul_dtype=jnp.float32))
    assert out_f32.shape == (batch, output_dim)
    assert jnp.allclose(out_f32, ref, atol=1e-4, rtol=1e-4), "f32 kernel mismatch vs reference"

    # 2) bf16 matmul path (perf config for v6e/v7x): f32 accumulation, relaxed tolerance.
    out_bf16 = jax.block_until_ready(
        news_encoder_forward(x, hidden_params, out_w, out_b, matmul_dtype=jnp.bfloat16))
    assert out_bf16.shape == (batch, output_dim)
    assert jnp.allclose(out_bf16, ref, atol=5e-2, rtol=5e-2), "bf16 kernel mismatch vs reference"

    # TODO(synk): training-mode BatchNorm (batch statistics + running-stat update) and
    # stochastic Dropout are not implemented; kernel covers eval/inference forward only.
    print("KERNEL_OK")
</pallas_src>

<mosaic_0001>
module attributes {stable_mosaic.version = 11 : i64} {
  func.func @news_encoder_kernel(%arg0: i32, %arg1: memref<256x128xf32, #tpu.memory_space<vmem>>, %arg2: memref<3x128x128xf32, #tpu.memory_space<vmem>>, %arg3: memref<3x1x128xf32, #tpu.memory_space<vmem>>, %arg4: memref<128x128xf32, #tpu.memory_space<vmem>>, %arg5: memref<1x128xf32, #tpu.memory_space<vmem>>, %arg6: memref<256x128xf32, #tpu.memory_space<vmem>>) attributes {dimension_semantics = [#tpu.dimension_semantics<parallel>], iteration_bounds = array<i64: 2>, scalar_prefetch = 0 : i64, scratch_operands = 0 : i64, tpu.core_type = #tpu.core_type<tc>, window_params = [{transform_indices = @transform_0, window_bounds = array<i64: 256, 128>}, {pipeline_mode = #tpu.pipeline_mode<synchronous>, transform_indices = @transform_1, window_bounds = array<i64: 3, 128, 128>}, {pipeline_mode = #tpu.pipeline_mode<synchronous>, transform_indices = @transform_2, window_bounds = array<i64: 3, 1, 128>}, {pipeline_mode = #tpu.pipeline_mode<synchronous>, transform_indices = @transform_3, window_bounds = array<i64: 128, 128>}, {pipeline_mode = #tpu.pipeline_mode<synchronous>, transform_indices = @transform_4, window_bounds = array<i64: 1, 128>}, {transform_indices = @transform_5, window_bounds = array<i64: 256, 128>}]} {
    %c0 = arith.constant 0 : index
    %c0_0 = arith.constant 0 : index
    %0 = vector.load %arg1[%c0, %c0_0] : memref<256x128xf32, #tpu.memory_space<vmem>>, vector<256x128xf32>
    %c0_1 = arith.constant 0 : index
    %c0_2 = arith.constant 0 : index
    %c0_3 = arith.constant 0 : index
    %1 = vector.load %arg2[%c0_1, %c0_2, %c0_3] : memref<3x128x128xf32, #tpu.memory_space<vmem>>, vector<1x128x128xf32>
    %2 = vector.shape_cast %1 : vector<1x128x128xf32> to vector<128x128xf32>
    %cst = arith.constant dense<0.000000e+00> : vector<256x128xf32>
    %3 = tpu.matmul %0, %2, %cst {dimension_numbers = #tpu.dot_dimension_numbers<[1], [0], [0], [1], [0, 0, 1, 1], [], []>} : vector<256x128xf32>, vector<128x128xf32>, vector<256x128xf32> -> vector<256x128xf32>
    %c0_4 = arith.constant 0 : index
    %c0_5 = arith.constant 0 : index
    %c0_6 = arith.constant 0 : index
    %4 = vector.load %arg3[%c0_4, %c0_5, %c0_6] : memref<3x1x128xf32, #tpu.memory_space<vmem>>, vector<1x1x128xf32>
    %5 = vector.shape_cast %4 : vector<1x1x128xf32> to vector<1x128xf32>
    %6 = vector.broadcast %5 : vector<1x128xf32> to vector<256x128xf32>
    %7 = arith.addf %3, %6 : vector<256x128xf32>
    %cst_7 = arith.constant 0.000000e+00 : f32
    %8 = vector.broadcast %cst_7 : f32 to vector<256x128xf32>
    %9 = arith.maximumf %7, %8 : vector<256x128xf32>
    %c1 = arith.constant 1 : index
    %c0_8 = arith.constant 0 : index
    %c0_9 = arith.constant 0 : index
    %10 = vector.load %arg2[%c1, %c0_8, %c0_9] : memref<3x128x128xf32, #tpu.memory_space<vmem>>, vector<1x128x128xf32>
    %11 = vector.shape_cast %10 : vector<1x128x128xf32> to vector<128x128xf32>
    %cst_10 = arith.constant dense<0.000000e+00> : vector<256x128xf32>
    %12 = tpu.matmul %9, %11, %cst_10 {dimension_numbers = #tpu.dot_dimension_numbers<[1], [0], [0], [1], [0, 0, 1, 1], [], []>} : vector<256x128xf32>, vector<128x128xf32>, vector<256x128xf32> -> vector<256x128xf32>
    %c1_11 = arith.constant 1 : index
    %c0_12 = arith.constant 0 : index
    %c0_13 = arith.constant 0 : index
    %13 = vector.load %arg3[%c1_11, %c0_12, %c0_13] : memref<3x1x128xf32, #tpu.memory_space<vmem>>, vector<1x1x128xf32>
    %14 = vector.shape_cast %13 : vector<1x1x128xf32> to vector<1x128xf32>
    %15 = vector.broadcast %14 : vector<1x128xf32> to vector<256x128xf32>
    %16 = arith.addf %12, %15 : vector<256x128xf32>
    %cst_14 = arith.constant 0.000000e+00 : f32
    %17 = vector.broadcast %cst_14 : f32 to vector<256x128xf32>
    %18 = arith.maximumf %16, %17 : vector<256x128xf32>
    %c2 = arith.constant 2 : index
    %c0_15 = arith.constant 0 : index
    %c0_16 = arith.constant 0 : index
    %19 = vector.load %arg2[%c2, %c0_15, %c0_16] : memref<3x128x128xf32, #tpu.memory_space<vmem>>, vector<1x128x128xf32>
    %20 = vector.shape_cast %19 : vector<1x128x128xf32> to vector<128x128xf32>
    %cst_17 = arith.constant dense<0.000000e+00> : vector<256x128xf32>
    %21 = tpu.matmul %18, %20, %cst_17 {dimension_numbers = #tpu.dot_dimension_numbers<[1], [0], [0], [1], [0, 0, 1, 1], [], []>} : vector<256x128xf32>, vector<128x128xf32>, vector<256x128xf32> -> vector<256x128xf32>
    %c2_18 = arith.constant 2 : index
    %c0_19 = arith.constant 0 : index
    %c0_20 = arith.constant 0 : index
    %22 = vector.load %arg3[%c2_18, %c0_19, %c0_20] : memref<3x1x128xf32, #tpu.memory_space<vmem>>, vector<1x1x128xf32>
    %23 = vector.shape_cast %22 : vector<1x1x128xf32> to vector<1x128xf32>
    %24 = vector.broadcast %23 : vector<1x128xf32> to vector<256x128xf32>
    %25 = arith.addf %21, %24 : vector<256x128xf32>
    %cst_21 = arith.constant 0.000000e+00 : f32
    %26 = vector.broadcast %cst_21 : f32 to vector<256x128xf32>
    %27 = arith.maximumf %25, %26 : vector<256x128xf32>
    %c0_22 = arith.constant 0 : index
    %c0_23 = arith.constant 0 : index
    %28 = vector.load %arg4[%c0_22, %c0_23] : memref<128x128xf32, #tpu.memory_space<vmem>>, vector<128x128xf32>
    %cst_24 = arith.constant dense<0.000000e+00> : vector<256x128xf32>
    %29 = tpu.matmul %27, %28, %cst_24 {dimension_numbers = #tpu.dot_dimension_numbers<[1], [0], [0], [1], [0, 0, 1, 1], [], []>} : vector<256x128xf32>, vector<128x128xf32>, vector<256x128xf32> -> vector<256x128xf32>
    %c0_25 = arith.constant 0 : index
    %c0_26 = arith.constant 0 : index
    %30 = vector.load %arg5[%c0_25, %c0_26] : memref<1x128xf32, #tpu.memory_space<vmem>>, vector<1x128xf32>
    %31 = vector.broadcast %30 : vector<1x128xf32> to vector<256x128xf32>
    %32 = arith.addf %29, %31 : vector<256x128xf32>
    %c0_27 = arith.constant 0 : index
    %c0_28 = arith.constant 0 : index
    %33 = vector.load %arg6[%c0_27, %c0_28] : memref<256x128xf32, #tpu.memory_space<vmem>>, vector<256x128xf32>
    tpu.vector_store %arg6[%c0_27, %c0_28], %32 {strides = array<i32>} : memref<256x128xf32, #tpu.memory_space<vmem>>, vector<256x128xf32>,
    return
  }
  func.func @transform_0(%arg0: i32) -> (i32, i32) {
    %c0_i32 = arith.constant 0 : i32
    %c0_i32_0 = arith.constant 0 : i32
    return %arg0, %c0_i32 : i32, i32
  }
  func.func @transform_1(%arg0: i32) -> (i32, i32, i32) {
    %c0_i32 = arith.constant 0 : i32
    %c0_i32_0 = arith.constant 0 : i32
    %c0_i32_1 = arith.constant 0 : i32
    %c0_i32_2 = arith.constant 0 : i32
    return %c0_i32, %c0_i32_0, %c0_i32_1 : i32, i32, i32
  }
  func.func @transform_2(%arg0: i32) -> (i32, i32, i32) {
    %c0_i32 = arith.constant 0 : i32
    %c0_i32_0 = arith.constant 0 : i32
    %c0_i32_1 = arith.constant 0 : i32
    %c0_i32_2 = arith.constant 0 : i32
    return %c0_i32, %c0_i32_0, %c0_i32_1 : i32, i32, i32
  }
  func.func @transform_3(%arg0: i32) -> (i32, i32) {
    %c0_i32 = arith.constant 0 : i32
    %c0_i32_0 = arith.constant 0 : i32
    %c0_i32_1 = arith.constant 0 : i32
    return %c0_i32, %c0_i32_0 : i32, i32
  }
  func.func @transform_4(%arg0: i32) -> (i32, i32) {
    %c0_i32 = arith.constant 0 : i32
    %c0_i32_0 = arith.constant 0 : i32
    %c0_i32_1 = arith.constant 0 : i32
    return %c0_i32, %c0_i32_0 : i32, i32
  }
  func.func @transform_5(%arg0: i32) -> (i32, i32) {
    %c0_i32 = arith.constant 0 : i32
    %c0_i32_0 = arith.constant 0 : i32
    return %arg0, %c0_i32 : i32, i32
  }
}

</mosaic_0001>

<bundles_post_ra>
// kernel: _run.1
= control target key start
LH: loop header
LB: loop body
LE: loop exit
PB: predicated region body
PF: predicated region fallthrough
CT: control target
= control target key end

     0   :  { %10 = vsyncpa [#allocation3], 0  ;;  %s2933_s0 = inlined_call_operand.hbm [shape: f32[512,128], index: 0, kind: input, shape index: {}]   ;;  %s2934_s1 = inlined_call_operand.hbm [shape: f32[3,128,128], index: 1, kind: input, shape index: {}]   ;;  %s2935_s2 = inlined_call_operand.vmem [shape: f32[3,1,128], index: 2, kind: input, shape index: {}]   ;;  %s2936_s3 = inlined_call_operand.hbm [shape: f32[128,128], index: 3, kind: input, shape index: {}]   ;;  %s2937_s4 = inlined_call_operand.vmem [shape: f32[1,128], index: 4, kind: input, shape index: {}]   ;;  %s2938_s5 = inlined_call_operand.hbm [shape: f32[512,128], index: 5, kind: output, shape index: {}]  }
   0x1   :  { %12 = vsyncpa [#allocation3 + $0x1], 0 }
   0x2   :  { %13 = vsyncpa [#allocation6], 0 }
   0x3   :  { %14 = vsyncpa [#allocation4], 0 }
   0x4   :  { %16 = vsyncpa [#allocation4 + $0x1], 0  ;;  %s2469_s18 = smov 0   ;;  %s2471_s19 = smov 0  }
   0x5   :  { %s2473_s20 = smov 0   ;;  %s2475_s21 = smov 0  }
   0x6 LB: > { %s2490_s22 = sadd.s32 4294967295, %s2429_s21   ;;  %s1536_s23 = sadd.s32 4294967294, %s2429_s21   ;;  %s2429_s21 = sphi %s2475_s21, %s2958_s21   ;;  %s2425_s20 = sphi %s2473_s20, %s2957_s20   ;;  %s2421_s19 = sphi %s2471_s19, %s2956_s19   ;;  %s2417_s18 = sphi %s2469_s18, %s2955_s18  }
   0x7   : > { %p42_p0 = scmp.ne.s32.totalorder %s2421_s19, %s2417_s18  ;;  %p2939_p1 = scmp.eq.s32.totalorder %s2490_s22, 0 }
   0x8   : > { %p156_p3 = scmp.eq.s32.totalorder %s1536_s23, 1  ;;  %p1537_p5 = scmp.ge.s32.totalorder %s2429_s21, 1 }
   0x9   : > { %p2499_p4 = por %p2939_p1, %p42_p0  ;;  %p163_p7 = scmp.lt.s32.totalorder %s2429_s21, 3 }
   0xa   : > { %p2504_p6 = por %p156_p3, %p42_p0  ;;  %s2431_s27 = smov [#allocation5]  }
   0xb   : > { %s2942_s24 = scalar_select %p2499_p4, 1, 0 }
   0xc   : > { %s2943_s25 = scalar_select %p2504_p6, 1, 0 }
   0xd   : > { %p2509_p8 = pnand %p1537_p5, %p163_p7  ;;  %s175_s28 = sshll.u32 %s2431_s27, 4  ;;  %s2513_s28 = int_to_ptr.vmem [resolvable:$true] %s175_s28 }
   0xe   : > { %s2432_s30 = smov [#allocation7]   ;;  %s2273_s9 = scalar_lea.hbm %s2934_s1, 6144 }
   0xf   : > { %p2214_p9 = pneg %p2509_p8  ;;  %s191_s6 = sshll.u32 %s2432_s30, 4  ;;  %s2524_s6 = int_to_ptr.vmem [resolvable:$true] %s191_s6 }
  0x10   : > { %p2274_p12 = scmp.ne.s32.totalorder %s2934_s1, %s2273_s9  ;;  %p2280_p5 = scmp.lt.u32.totalorder %s2273_s9, %s2934_s1 }
  0x11   : > { %p2520_p11 = pnand %p2214_p9, %p2939_p1 }
  0x13   : > { %p2275_p13 = pneg %p2520_p11 }
  0x15   : > { %p2276_p0 = pnand %p2275_p13, %p2274_p12 }
  0x17   : > { %p2277_p3 = pneg %p2276_p0 }
  0x19   : > { %p2282_p7 = pnand %p2280_p5, %p2277_p3 }
  0x1b   : > { %2285 = shalt.err (!%p2282_p7)
}
  0x1c   : > { %s2286_s14 = scalar_lea.vmem %s2513_s28, 6144  ;;  %p2294_p2 = scmp.lt.s32.totalorder %s2513_s28, %s2513_s28 }
  0x1d   : > { %p2287_p9 = scmp.ne.s32.totalorder %s2513_s28, %s2286_s14  ;;  %p2295_p12 = scmp.lt.s32.totalorder %s2286_s14, %s2286_s14 }
  0x1f   : > { %p2289_p10 = pnand %p2287_p9, %p2275_p13  ;;  %p2296_p0 = por %p2295_p12, %p2294_p2 }
  0x21   : > { %p2290_p1 = pneg %p2289_p10 }
  0x23   : > { %p2297_p6 = pnand %p2296_p0, %p2290_p1 }
  0x25   : > { %2300 = shalt.err (!%p2297_p6)
}
  0x26   : > { %s2433_s15 = smov 128   ;;  %s2434_s16 = smov 8  }
  0x27   : > { %2217 = dma.hbm_to_vmem [thread:$0]  (!%p2520_p11), %s2934_s1, 6144, %s2513_s28, [#allocation6], %s2433_s15, %s2433_s15, %s2434_s16  }
  0x28   : > { %s2301_s7 = scalar_lea.hbm %s2936_s3, 2048 }
  0x29   : > { %p2302_p1 = scmp.ne.s32.totalorder %s2936_s3, %s2301_s7  ;;  %p2308_p10 = scmp.lt.u32.totalorder %s2301_s7, %s2936_s3 }
  0x2b   : > { %p2304_p2 = pnand %p2302_p1, %p2275_p13 }
  0x2d   : > { %p2305_p6 = pneg %p2304_p2 }
  0x2f   : > { %p2310_p3 = pnand %p2308_p10, %p2305_p6 }
  0x31   : > { %2313 = shalt.err (!%p2310_p3)
}
  0x32   : > { %s2314_s28 = scalar_lea.vmem %s2524_s6, 2048  ;;  %p2322_p12 = scmp.lt.s32.totalorder %s2524_s6, %s2524_s6 }
  0x33   : > { %p2315_p5 = scmp.ne.s32.totalorder %s2524_s6, %s2314_s28  ;;  %p2323_p0 = scmp.lt.s32.totalorder %s2314_s28, %s2314_s28 }
  0x35   : > { %p2317_p7 = pnand %p2315_p5, %p2275_p13  ;;  %p2324_p1 = por %p2323_p0, %p2322_p12 }
  0x37   : > { %p2318_p9 = pneg %p2317_p7 }
  0x39   : > { %p2325_p2 = pnand %p2324_p1, %p2318_p9 }
  0x3b   : > { %2328 = shalt.err (!%p2325_p2)
}
  0x3c   : > { %2220 = dma.hbm_to_vmem [thread:$0]  (!%p2520_p11), %s2936_s3, 2048, %s2524_s6, [#allocation6], %s2433_s15, %s2433_s15, %s2434_s16  }
  0x3d   : > { %s2585_s29 = sadd.s32 1, %s2429_s21   ;;  %s29_s14 = sadd.s32 1, %s2425_s20 }
  0x3e   : > { %s26_s17 = ssub.s32 %s2429_s21, %s2585_s29  ;;  %p36_p13 = scmp.ne.s32.totalorder %s2425_s20, %s2421_s19 }
  0x3f   : > { %p27_p6 = scmp.eq.s32.totalorder %s26_s17, 0  ;;  %p37_p10 = scmp.eq.s32.totalorder %s2429_s21, 0 }
  0x40   : > { %p2946_p3 = scmp.eq.s32.totalorder %s2490_s22, 1  ;;  %p2231_p7 = scmp.lt.s32.totalorder %s2429_s21, 2 }
  0x41   : > { %s2601_s27 = scalar_select %p27_p6, %s2425_s20, %s29_s14  }
  0x42   : > { %p2595_p5 = por %p2946_p3, %p36_p13  ;;  %p38_p9 = por %p37_p10, %p36_p13 }
  0x43   : > { %s208_s30 = sand.u32 1, %s2425_s20   ;;  %s1560_s6 = sshll.u32 %s2429_s21, 12 }
  0x44   : > { %s2947_s23 = scalar_select %p2595_p5, 1, 0 }
  0x45   : > { %s1541_s7 = sshll.u32 %s208_s30, 8  ;;  %s2608_s10 = scalar_lea.hbm %s2933_s0, %s1560_s6 }
  0x46   : > { %s212_s11 = scalar_lea.vmem [#allocation2], %s1541_s7  ;;  %p2612_p11 = pnand %p2231_p7, %p38_p9 }
  0x47   : > { %s219_s28 = sshll.u32 %s212_s11, 4  ;;  %s2616_s13 = scalar_lea.sflag [#allocation3], %s208_s30  ;;  %s2610_s28 = int_to_ptr.vmem [resolvable:$true] %s219_s28 }
  0x48   : > { %s2329_s14 = scalar_lea.hbm %s2608_s10, 4096  ;;  %p2331_p0 = pneg %p2612_p11 }
  0x49   : > { %p2330_p12 = scmp.ne.s32.totalorder %s2608_s10, %s2329_s14  ;;  %s2334_s6 = scalar_lea.hbm %s2933_s0, 8192 }
  0x4a   : > { %p2335_p13 = scmp.lt.u32.totalorder %s2608_s10, %s2933_s0  ;;  %p2336_p6 = scmp.lt.u32.totalorder %s2334_s6, %s2329_s14 }
  0x4b   : > { %p2332_p1 = pnand %p2331_p0, %p2330_p12  ;;  %p2338_p3 = scmp.lt.u32.totalorder %s2329_s14, %s2608_s10 }
  0x4c   : > { %p2337_p10 = por %p2336_p6, %p2335_p13 }
  0x4d   : > { %p2333_p2 = pneg %p2332_p1 }
  0x4e   : > { %p2339_p7 = por %p2338_p3, %p2337_p10 }
  0x50   : > { %p2340_p9 = pnand %p2339_p7, %p2333_p2 }
  0x52   : > { %2343 = shalt.err (!%p2340_p9)
}
  0x53   : > { %s2344_s30 = scalar_lea.vmem %s2610_s28, 4096  ;;  %s2435_s11 = smov [#allocation2]  }
  0x54   : > { %p2345_p12 = scmp.ne.s32.totalorder %s2610_s28, %s2344_s30  ;;  %s2349_s17 = sshll.u32 %s2435_s11, 4  ;;  %s2350_s17 = int_to_ptr.vmem [resolvable:$false] %s2349_s17 }
  0x55   : > { %s2351_s7 = scalar_lea.vmem %s2350_s17, 8192  ;;  %p2352_p4 = scmp.lt.s32.totalorder %s2610_s28, %s2350_s17 }
  0x56   : > { %p2347_p1 = pnand %p2345_p12, %p2331_p0  ;;  %p2353_p13 = scmp.lt.s32.totalorder %s2351_s7, %s2344_s30 }
  0x58   : > { %p2348_p5 = pneg %p2347_p1  ;;  %p2354_p6 = por %p2353_p13, %p2352_p4 }
  0x5a   : > { %p2355_p10 = pnand %p2354_p6, %p2348_p5 }
  0x5c   : > { %2358 = shalt.err (!%p2355_p10)
}
  0x5d   : > { %2224 = dma.hbm_to_vmem [thread:$0]  (!%p2612_p11), %s2608_s10, 4096, %s2610_s28, %s2616_s13, %s2433_s15, %s2433_s15, %s2434_s16  }
  0x5e   : > { %231 = sbr.rel (%p2509_p8) target bundleno = 1084 (0x43c), region = 40  ;;  %s2650_s14 = sand.u32 (!%p2509_p8), 1, %s2421_s19  }
  0x5f   : > { %s1545_s6 = sshll.u32 (!%p2509_p8), %s2650_s14, 8  ;;  %s234_s8 = scalar_lea.sflag (!%p2509_p8), [#allocation3], %s2650_s14 }
  0x60   : > { %s2656_s12 = scalar_lea.vmem (!%p2509_p8), [#allocation2], %s1545_s6  ;;  %p2949_p4 = scmp.ne.s32.totalorder (!%p2509_p8), %s2942_s24, 0 }
  0x65   : > { %2404 = dma.done.wait (%p2949_p4), %s234_s8, 4096  }
  0x66   : > { %2406 = vsyncadd (%p2949_p4), %s234_s8, 4294963200  ;;  %p2950_p5 = scmp.eq.s32.totalorder %s2490_s22, 0 }
  0x68   : > { %2408 = dma.done.wait (%p2950_p5), [#allocation6], 8192   ;;  %p2951_p8 = pmov %p2950_p5 }
  0x69   : > { %v306_v0 = vld [vmem:[#allocation5] sm:$0xff]  ;;  %v307_v1 = vld [vmem:[#allocation5 + $0x8] sm:$0xff]  ;;  %v308_v2 = vld [vmem:[#allocation5 + $0x10] sm:$0xff]  ;;  %s2818_s30 = scalar_lea.vmem [#allocation8], %s1545_s6  ;;  %s1561_s11 = sshll.u32 %s2490_s22, 12 }
  0x6a   : > { %2410 = vsyncadd (%p2951_p8), [#allocation6], 4294959104  ;;  %v2074_v3 = vpack.c.bf16 %v307_v1, %v306_v0  ;;  %v309_v4 = vld [vmem:[#allocation5 + $0x18] sm:$0xff]  ;;  %v310_v6 = vld [vmem:[#allocation5 + $0x20] sm:$0xff]  ;;  %s1444_s17 = sshll.u32 %s2818_s30, 4  ;;  %s2884_s8 = scalar_lea.hbm %s2938_s5, %s1561_s11  ;;  %s2886_s17 = int_to_ptr.vmem [resolvable:$true] %s1444_s17 }
  0x6b   : > { %v2078_v5 = vpack.c.bf16 %v309_v4, %v308_v2  ;;  %v311_v7 = vld [vmem:[#allocation5 + $0x28] sm:$0xff]  ;;  %v274_v9 = vld [vmem:[%s2656_s12] sm:$0xff]  ;;  %v312_v10 = vld [vmem:[#allocation5 + $0x30] sm:$0xff]  ;;  %s1431_s22 = scalar_lea.sflag [#allocation4], %s2650_s14  ;;  %p2952_p0 = scmp.ne.s32.totalorder %s2947_s23, 0 }
  0x6c   : > { %2075 = vmatprep.subr.bf16.mxu0 %v2074_v3  ;;  %v2082_v8 = vpack.c.bf16 %v311_v7, %v310_v6  ;;  %v313_v11 = vld [vmem:[#allocation5 + $0x38] sm:$0xff]  ;;  %1786 = vmatprep.mubr.f32.mxu0 %v274_v9  ;;  %v314_v13 = vld [vmem:[#allocation5 + $0x40] sm:$0xff]  ;;  %v315_v14 = vld [vmem:[#allocation5 + $0x48] sm:$0xff]  ;;  %s2436_s24 = smov [#allocation8]  }
  0x6d   : > { %2077 = vmatpush3.bf16.msra.mxu0 %v2074_v3  ;;  %v2086_v12 = vpack.c.bf16 %v313_v11, %v312_v10  ;;  %v2090_v15 = vpack.c.bf16 %v315_v14, %v314_v13  ;;  %v316_v16 = vld [vmem:[#allocation5 + $0x50] sm:$0xff]  ;;  %v317_v17 = vld [vmem:[#allocation5 + $0x58] sm:$0xff]  ;;  %v587_v18 = vld [vmem:[#allocation5 + $0x80] sm:$0xff]  ;;  %s2363_s26 = sshll.u32 %s2436_s24, 4  ;;  %s2364_s26 = int_to_ptr.vmem [resolvable:$false] %s2363_s26 }
  0x6e   : > { %2079 = vmatprep.subr.bf16.mxu0 %v2078_v5  ;;  %v588_v19 = vld [vmem:[#allocation5 + $0x88] sm:$0xff]  ;;  %v589_v20 = vld [vmem:[#allocation5 + $0x90] sm:$0xff]  ;;  %v2094_v21 = vpack.c.bf16 %v317_v17, %v316_v16  ;;  %v318_v22 = vld [vmem:[#allocation5 + $0x60] sm:$0xff]  ;;  %s2365_s15 = scalar_lea.vmem %s2364_s26, 8192  ;;  %p2366_p7 = scmp.lt.s32.totalorder %s2886_s17, %s2364_s26 }
  0x6f   : > { %v2106_v23 = vpack.c.bf16 %v588_v19, %v587_v18  ;;  %v590_v24 = vld [vmem:[#allocation5 + $0x98] sm:$0xff]  ;;  %v319_v25 = vld [vmem:[#allocation5 + $0x68] sm:$0xff]  ;;  %v591_v27 = vld [vmem:[#allocation5 + $0xa0] sm:$0xff] }
  0x70   : > { %v2110_v26 = vpack.c.bf16 %v590_v24, %v589_v20  ;;  %v592_v28 = vld [vmem:[#allocation5 + $0xa8] sm:$0xff]  ;;  %v2098_v29 = vpack.c.bf16 %v319_v25, %v318_v22  ;;  %v320_v30 = vld [vmem:[#allocation5 + $0x70] sm:$0xff]  ;;  %v321_v32 = vld [vmem:[#allocation5 + $0x78] sm:$0xff] }
  0x71   : > { %2081 = vmatpush3.bf16.msra.mxu0 %v2078_v5  ;;  %2107 = vmatprep.subr.bf16.mxu1 %v2106_v23  ;;  %v2114_v31 = vpack.c.bf16 %v592_v28, %v591_v27  ;;  %v593_v33 = vld [vmem:[#allocation5 + $0xb0] sm:$0xff]  ;;  %v594_v34 = vld [vmem:[#allocation5 + $0xb8] sm:$0xff]  ;;  %v2102_v35 = vpack.c.bf16 %v321_v32, %v320_v30  ;;  %v595_v37 = vld [vmem:[#allocation5 + $0xc0] sm:$0xff] }
  0x72   : > { %2083 = vmatprep.subr.bf16.mxu0 %v2082_v8  ;;  %2109 = vmatpush3.bf16.msra.mxu1 %v2106_v23  ;;  %v2118_v36 = vpack.c.bf16 %v594_v34, %v593_v33  ;;  %v596_v38 = vld [vmem:[#allocation5 + $0xc8] sm:$0xff]  ;;  %v597_v40 = vld [vmem:[#allocation5 + $0xd0] sm:$0xff]  ;;  %v598_v41 = vld [vmem:[#allocation5 + $0xd8] sm:$0xff] }
  0x73   : > { %2111 = vmatprep.subr.bf16.mxu1 %v2110_v26  ;;  %v2122_v39 = vpack.c.bf16 %v596_v38, %v595_v37  ;;  %v275_v42 = vld [vmem:[%s2656_s12 + $0x8] sm:$0xff]  ;;  %v276_v43 = vld [vmem:[%s2656_s12 + $0x10] sm:$0xff]  ;;  %v2126_v44 = vpack.c.bf16 %v598_v41, %v597_v40  ;;  %v599_v45 = vld [vmem:[#allocation5 + $0xe0] sm:$0xff] }
  0x74   : > { %v600_v46 = vld [vmem:[#allocation5 + $0xe8] sm:$0xff]  ;;  %v277_v47 = vld [vmem:[%s2656_s12 + $0x18] sm:$0xff]  ;;  %v278_v48 = vld [vmem:[%s2656_s12 + $0x20] sm:$0xff] }
  0x75   : > { %2085 = vmatpush3.bf16.msra.mxu0 %v2082_v8  ;;  %v2130_v49 = vpack.c.bf16 %v600_v46, %v599_v45  ;;  %v279_v50 = vld [vmem:[%s2656_s12 + $0x28] sm:$0xff]  ;;  %v280_v51 = vld [vmem:[%s2656_s12 + $0x30] sm:$0xff]  ;;  %v281_v52 = vld [vmem:[%s2656_s12 + $0x38] sm:$0xff] }
  0x76   : > { %2087 = vmatprep.subr.bf16.mxu0 %v2086_v12  ;;  %2113 = vmatpush3.bf16.msra.mxu1 %v2110_v26  ;;  %v282_v53 = vld [vmem:[%s2656_s12 + $0x40] sm:$0xff]  ;;  %v283_v54 = vld [vmem:[%s2656_s12 + $0x48] sm:$0xff]  ;;  %v284_v55 = vld [vmem:[%s2656_s12 + $0x50] sm:$0xff] }
  0x77   : > { %2115 = vmatprep.subr.bf16.mxu1 %v2114_v31  ;;  %v285_v56 = vld [vmem:[%s2656_s12 + $0x58] sm:$0xff]  ;;  %v286_v57 = vld [vmem:[%s2656_s12 + $0x60] sm:$0xff]  ;;  %v287_v58 = vld [vmem:[%s2656_s12 + $0x68] sm:$0xff] }
  0x78   : > { %v288_v59 = vld [vmem:[%s2656_s12 + $0x70] sm:$0xff]  ;;  %v289_v60 = vld [vmem:[%s2656_s12 + $0x78] sm:$0xff]  ;;  %v290_v61 = vld [vmem:[%s2656_s12 + $0x80] sm:$0xff] }
  0x79   : > { %2089 = vmatpush3.bf16.msra.mxu0 %v2086_v12  ;;  %v291_v62 = vld [vmem:[%s2656_s12 + $0x88] sm:$0xff]  ;;  %v292_v63 = vld [vmem:[%s2656_s12 + $0x90] sm:$0xff]  ;;  %v293_v0 = vld [vmem:[%s2656_s12 + $0x98] sm:$0xff] }
  0x7a   : > { %2091 = vmatprep.subr.bf16.mxu0 %v2090_v15  ;;  %2117 = vmatpush3.bf16.msra.mxu1 %v2114_v31  ;;  %v294_v1 = vld [vmem:[%s2656_s12 + $0xa0] sm:$0xff]  ;;  %v295_v2 = vld [vmem:[%s2656_s12 + $0xa8] sm:$0xff]  ;;  %v296_v3 = vld [vmem:[%s2656_s12 + $0xb0] sm:$0xff] }
  0x7b   : > { %2119 = vmatprep.subr.bf16.mxu1 %v2118_v36  ;;  %v297_v4 = vld [vmem:[%s2656_s12 + $0xb8] sm:$0xff]  ;;  %v298_v5 = vld [vmem:[%s2656_s12 + $0xc0] sm:$0xff]  ;;  %v299_v6 = vld [vmem:[%s2656_s12 + $0xc8] sm:$0xff] }
  0x7c   : > { %v300_v7 = vld [vmem:[%s2656_s12 + $0xd0] sm:$0xff]  ;;  %v301_v8 = vld [vmem:[%s2656_s12 + $0xd8] sm:$0xff]  ;;  %v302_v9 = vld [vmem:[%s2656_s12 + $0xe0] sm:$0xff] }
  0x7d   : > { %2093 = vmatpush3.bf16.msra.mxu0 %v2090_v15  ;;  %v303_v10 = vld [vmem:[%s2656_s12 + $0xe8] sm:$0xff]  ;;  %v304_v11 = vld [vmem:[%s2656_s12 + $0xf0] sm:$0xff]  ;;  %v305_v12 = vld [vmem:[%s2656_s12 + $0xf8] sm:$0xff]  ;;  %s2359_s12 = scalar_lea.vmem %s2886_s17, 4096 }
  0x7e   : > { %2095 = vmatprep.subr.bf16.mxu0 %v2094_v21  ;;  %2121 = vmatpush3.bf16.msra.mxu1 %v2118_v36  ;;  %v601_v13 = vld [vmem:[#allocation5 + $0xf0] sm:$0xff]  ;;  %v602_v14 = vld [vmem:[#allocation5 + $0xf8] sm:$0xff]  ;;  %v869_v16 = vld [vmem:[#allocation5 + $0x100] sm:$0xff]  ;;  %p2360_p11 = scmp.ne.s32.totalorder %s2886_s17, %s2359_s12  ;;  %p2367_p9 = scmp.lt.s32.totalorder %s2365_s15, %s2359_s12 }
  0x7f   : > { %2123 = vmatprep.subr.bf16.mxu1 %v2122_v39  ;;  %v2134_v15 = vpack.c.bf16 %v602_v14, %v601_v13  ;;  %v870_v17 = vld [vmem:[#allocation5 + $0x108] sm:$0xff]  ;;  %v871_v18 = vld [vmem:[#allocation5 + $0x110] sm:$0xff]  ;;  %v872_v20 = vld [vmem:[#allocation5 + $0x118] sm:$0xff] }
  0x80   : > { %v2138_v19 = vpack.c.bf16 %v870_v17, %v869_v16  ;;  %v873_v22 = vld [vmem:[#allocation5 + $0x120] sm:$0xff]  ;;  %v874_v23 = vld [vmem:[#allocation5 + $0x128] sm:$0xff]  ;;  %v875_v25 = vld [vmem:[#allocation5 + $0x130] sm:$0xff]  ;;  %p2361_p2 = pnand %p2360_p11, %p2952_p0  ;;  %p2368_p12 = por %p2367_p9, %p2366_p7 }
  0x81   : > { %2097 = vmatpush3.bf16.msra.mxu0 %v2094_v21  ;;  %v2142_v21 = vpack.c.bf16 %v872_v20, %v871_v18  ;;  %v2146_v24 = vpack.c.bf16 %v874_v23, %v873_v22  ;;  %v876_v26 = vld [vmem:[#allocation5 + $0x138] sm:$0xff]  ;;  %v877_v28 = vld [vmem:[#allocation5 + $0x140] sm:$0xff]  ;;  %v879_v31 = vld [vmem:[#allocation5 + $0x150] sm:$0xff] }
  0x82   : > { %2099 = vmatprep.subr.bf16.mxu0 %v2098_v29  ;;  %2125 = vmatpush3.bf16.msra.mxu1 %v2122_v39  ;;  %v2150_v27 = vpack.c.bf16 %v876_v26, %v875_v25  ;;  %v880_v32 = vld [vmem:[#allocation5 + $0x158] sm:$0xff]  ;;  %v881_v34 = vld [vmem:[#allocation5 + $0x160] sm:$0xff]  ;;  %v883_v37 = vld [vmem:[#allocation5 + $0x170] sm:$0xff]  ;;  %p2362_p3 = pneg %p2361_p2 }
  0x83   : > { %2127 = vmatprep.subr.bf16.mxu1 %v2126_v44  ;;  %v2158_v33 = vpack.c.bf16 %v880_v32, %v879_v31  ;;  %v884_v38 = vld [vmem:[#allocation5 + $0x178] sm:$0xff]  ;;  %v2701_v40 = vld [vmem:[%s2935_s2] ss:$0 sm:$0xff] }
  0x84   : > { %v2166_v39 = vpack.c.bf16 %v884_v38, %v883_v37  ;;  %p2369_p1 = pnand %p2368_p12, %p2362_p3 }
  0x85   : > { %2101 = vmatpush3.bf16.msra.mxu0 %v2098_v29  ;;  %v878_v29 = vld [vmem:[#allocation5 + $0x148] sm:$0xff] }
  0x86   : > { %2103 = vmatprep.subr.bf16.mxu0 %v2102_v35  ;;  %2129 = vmatpush3.bf16.msra.mxu1 %v2126_v44  ;;  %v2154_v30 = vpack.c.bf16 %v878_v29, %v877_v28 }
  0x87   : > { %2131 = vmatprep.subr.bf16.mxu1 %v2130_v49 }
  0x89   : > { %2105 = vmatpush3.bf16.msra.mxu0 %v2102_v35  ;;  %v882_v35 = vld [vmem:[#allocation5 + $0x168] sm:$0xff] }
  0x8a   : > { %2133 = vmatpush3.bf16.msra.mxu1 %v2130_v49  ;;  %2139 = vmatprep.subr.bf16.mxu0 %v2138_v19  ;;  %v2162_v36 = vpack.c.bf16 %v882_v35, %v881_v34 }
  0x8b   : > { %2135 = vmatprep.subr.bf16.mxu1 %v2134_v15 }
  0x8c   : > { %1787 = vmatmul.mubr.f32.vlgmr.msra.gmra.mrb[0].mxu0 %v275_v42 }
  0x8d   : > { %1789 = vmatprep.mubr.f32.mxu0 %v276_v43  ;;  %2141 = vmatpush3.bf16.msra.mxu0 %v2138_v19 }
  0x8e   : > { %2137 = vmatpush3.bf16.msra.mxu1 %v2134_v15  ;;  %2143 = vmatprep.subr.bf16.mxu0 %v2142_v21 }
  0x90   : > { %1790 = vmatmul.mubr.f32.gmra.mrb[2].mxu0 %v277_v47 }
  0x91   : > { %1792 = vmatprep.mubr.f32.mxu0 %v278_v48  ;;  %2145 = vmatpush3.bf16.msra.mxu0 %v2142_v21 }
  0x92   : > { %2147 = vmatprep.subr.bf16.mxu0 %v2146_v24 }
  0x94   : > { %1793 = vmatmul.mubr.f32.gmra.mrb[4].mxu0 %v279_v50 }
  0x95   : > { %1795 = vmatprep.mubr.f32.mxu0 %v280_v51  ;;  %2149 = vmatpush3.bf16.msra.mxu0 %v2146_v24 }
  0x96   : > { %2151 = vmatprep.subr.bf16.mxu0 %v2150_v27 }
  0x98   : > { %1796 = vmatmul.mubr.f32.gmra.mrb[6].mxu0 %v281_v52 }
  0x99   : > { %1798 = vmatprep.mubr.f32.mxu0 %v282_v53  ;;  %2153 = vmatpush3.bf16.msra.mxu0 %v2150_v27 }
  0x9a   : > { %2155 = vmatprep.subr.bf16.mxu0 %v2154_v30 }
  0x9c   : > { %1799 = vmatmul.mubr.f32.gmra.mrb[8].mxu0 %v283_v54 }
  0x9d   : > { %1801 = vmatprep.mubr.f32.mxu0 %v284_v55  ;;  %2157 = vmatpush3.bf16.msra.mxu0 %v2154_v30 }
  0x9e   : > { %2159 = vmatprep.subr.bf16.mxu0 %v2158_v33 }
  0xa0   : > { %1802 = vmatmul.mubr.f32.gmra.mrb[10].mxu0 %v285_v56 }
  0xa1   : > { %1804 = vmatprep.mubr.f32.mxu0 %v286_v57  ;;  %2161 = vmatpush3.bf16.msra.mxu0 %v2158_v33 }
  0xa2   : > { %2163 = vmatprep.subr.bf16.mxu0 %v2162_v36 }
  0xa4   : > { %1805 = vmatmul.mubr.f32.gmra.mrb[12].mxu0 %v287_v58 }
  0xa5   : > { %1807 = vmatprep.mubr.f32.mxu0 %v288_v59  ;;  %2165 = vmatpush3.bf16.msra.mxu0 %v2162_v36 }
  0xa6   : > { %2167 = vmatprep.subr.bf16.mxu0 %v2166_v39 }
  0xa8   : > { %1808 = vmatmul.mubr.f32.gmra.mrb[14].mxu0 %v289_v60 }
  0xa9   : > { %1810 = vmatprep.mubr.f32.mxu0 %v290_v61  ;;  %2169 = vmatpush3.bf16.msra.mxu0 %v2166_v39 }
  0xac   : > { %1811 = vmatmul.mubr.f32.gmra.mrb[16].mxu0 %v291_v62 }
  0xad   : > { %1813 = vmatprep.mubr.f32.mxu0 %v292_v63 }
  0xb0   : > { %1814 = vmatmul.mubr.f32.gmra.mrb[18].mxu0 %v293_v0 }
  0xb1   : > { %1816 = vmatprep.mubr.f32.mxu0 %v294_v1 }
  0xb4   : > { %1817 = vmatmul.mubr.f32.gmra.mrb[20].mxu0 %v295_v2 }
  0xb5   : > { %1819 = vmatprep.mubr.f32.mxu0 %v296_v3 }
  0xb8   : > { %1820 = vmatmul.mubr.f32.gmra.mrb[22].mxu0 %v297_v4 }
  0xb9   : > { %1822 = vmatprep.mubr.f32.mxu0 %v298_v5 }
  0xbc   : > { %1823 = vmatmul.mubr.f32.gmra.mrb[24].mxu0 %v299_v6 }
  0xbd   : > { %1825 = vmatprep.mubr.f32.mxu0 %v300_v7 }
  0xc0   : > { %1826 = vmatmul.mubr.f32.gmra.mrb[26].mxu0 %v301_v8 }
  0xc1   : > { %1828 = vmatprep.mubr.f32.mxu0 %v302_v9 }
  0xc4   : > { %1829 = vmatmul.mubr.f32.gmra.mrb[28].mxu0 %v303_v10 }
  0xc5   : > { %1831 = vmatprep.mubr.f32.mxu0 %v304_v11 }
  0xc8   : > { %1832 = vmatmul.mubr.f32.gmra.mrb[30].mxu0 %v305_v12 }
 0x15f   : > { %v1788_v41 = vpop.f32.mrb[0].mxu0 }
 0x160   : > { %v401_v42 = vadd.f32 %v1788_v41, %v2701_v40  ;;  %v395_v43 = vpop.f32.mrb[1].mxu0 }
 0x161   : > { %v396_v44 = vadd.f32 %v2701_v40, %v395_v43 }
 0x162   : > { %v555_v47 = vmax.f32 %v401_v42, 0.0 }
 0x163   : > { %v1791_v45 = vpop.f32.mrb[2].mxu0  ;;  %v554_v46 = vmax.f32 %v396_v44, 0.0 }
 0x164   : > { %v411_v48 = vadd.f32 %v1791_v45, %v2701_v40  ;;  %v405_v49 = vpop.f32.mrb[3].mxu0 }
 0x165   : > { %v406_v50 = vadd.f32 %v2701_v40, %v405_v49  ;;  %1866 = vmatprep.mubr.f32.mxu1 %v554_v46 }
 0x166   : > { %1867 = vmatmul.mubr.f32.vlgmr.msra.gmra.mrb[0].mxu1 %v555_v47  ;;  %v557_v53 = vmax.f32 %v411_v48, 0.0 }
 0x167   : > { %v556_v51 = vmax.f32 %v406_v50, 0.0  ;;  %v1794_v52 = vpop.f32.mrb[4].mxu0 }
 0x168   : > { %v421_v54 = vadd.f32 %v1794_v52, %v2701_v40  ;;  %v415_v55 = vpop.f32.mrb[5].mxu0 }
 0x169   : > { %v416_v56 = vadd.f32 %v2701_v40, %v415_v55  ;;  %1869 = vmatprep.mubr.f32.mxu1 %v556_v51 }
 0x16a   : > { %1870 = vmatmul.mubr.f32.gmra.mrb[2].mxu1 %v557_v53  ;;  %v559_v59 = vmax.f32 %v421_v54, 0.0 }
 0x16b   : > { %v558_v57 = vmax.f32 %v416_v56, 0.0  ;;  %v1797_v58 = vpop.f32.mrb[6].mxu0 }
 0x16c   : > { %v431_v60 = vadd.f32 %v1797_v58, %v2701_v40  ;;  %v425_v61 = vpop.f32.mrb[7].mxu0 }
 0x16d   : > { %v426_v62 = vadd.f32 %v2701_v40, %v425_v61  ;;  %1872 = vmatprep.mubr.f32.mxu1 %v558_v57 }
 0x16e   : > { %1873 = vmatmul.mubr.f32.gmra.mrb[4].mxu1 %v559_v59  ;;  %v561_v1 = vmax.f32 %v431_v60, 0.0 }
 0x16f   : > { %v560_v63 = vmax.f32 %v426_v62, 0.0  ;;  %v1800_v0 = vpop.f32.mrb[8].mxu0 }
 0x170   : > { %v441_v2 = vadd.f32 %v1800_v0, %v2701_v40  ;;  %v435_v3 = vpop.f32.mrb[9].mxu0 }
 0x171   : > { %v436_v4 = vadd.f32 %v2701_v40, %v435_v3  ;;  %1875 = vmatprep.mubr.f32.mxu1 %v560_v63 }
 0x172   : > { %1876 = vmatmul.mubr.f32.gmra.mrb[6].mxu1 %v561_v1  ;;  %v563_v7 = vmax.f32 %v441_v2, 0.0 }
 0x173   : > { %v562_v5 = vmax.f32 %v436_v4, 0.0  ;;  %v1803_v6 = vpop.f32.mrb[10].mxu0 }
 0x174   : > { %v451_v8 = vadd.f32 %v1803_v6, %v2701_v40  ;;  %v445_v9 = vpop.f32.mrb[11].mxu0 }
 0x175   : > { %v446_v10 = vadd.f32 %v2701_v40, %v445_v9  ;;  %1878 = vmatprep.mubr.f32.mxu1 %v562_v5 }
 0x176   : > { %1879 = vmatmul.mubr.f32.gmra.mrb[8].mxu1 %v563_v7  ;;  %v565_v13 = vmax.f32 %v451_v8, 0.0 }
 0x177   : > { %v564_v11 = vmax.f32 %v446_v10, 0.0  ;;  %v1806_v12 = vpop.f32.mrb[12].mxu0  ;;  %v1150_v10 = vld [vmem:[#allocation7] sm:$0xff] }
 0x178   : > { %v461_v14 = vadd.f32 %v1806_v12, %v2701_v40  ;;  %v455_v15 = vpop.f32.mrb[13].mxu0  ;;  %v1152_v12 = vld [vmem:[#allocation7 + $0x10] sm:$0xff] }
 0x179   : > { %v456_v16 = vadd.f32 %v2701_v40, %v455_v15  ;;  %1881 = vmatprep.mubr.f32.mxu1 %v564_v11  ;;  %v1151_v11 = vld [vmem:[#allocation7 + $0x8] sm:$0xff] }
 0x17a   : > { %1882 = vmatmul.mubr.f32.gmra.mrb[10].mxu1 %v565_v13  ;;  %v567_v19 = vmax.f32 %v461_v14, 0.0  ;;  %v2170_v13 = vpack.c.bf16 %v1151_v11, %v1150_v10  ;;  %v1153_v14 = vld [vmem:[#allocation7 + $0x18] sm:$0xff] }
 0x17b   : > { %v566_v17 = vmax.f32 %v456_v16, 0.0  ;;  %v1809_v18 = vpop.f32.mrb[14].mxu0  ;;  %v2174_v15 = vpack.c.bf16 %v1153_v14, %v1152_v12  ;;  %v1154_v16 = vld [vmem:[#allocation7 + $0x20] sm:$0xff] }
 0x17c   : > { %v471_v20 = vadd.f32 %v1809_v18, %v2701_v40  ;;  %v465_v21 = vpop.f32.mrb[15].mxu0  ;;  %2171 = vmatprep.subr.bf16.mxu1 %v2170_v13 }
 0x17d   : > { %v466_v22 = vadd.f32 %v2701_v40, %v465_v21  ;;  %1884 = vmatprep.mubr.f32.mxu1 %v566_v17  ;;  %v1155_v17 = vld [vmem:[#allocation7 + $0x28] sm:$0xff]  ;;  %2173 = vmatpush3.bf16.msra.mxu1 %v2170_v13  ;;  %v1158_v21 = vld [vmem:[#allocation7 + $0x40] sm:$0xff] }
 0x17e   : > { %1885 = vmatmul.mubr.f32.gmra.mrb[12].mxu1 %v567_v19  ;;  %v569_v25 = vmax.f32 %v471_v20, 0.0  ;;  %2175 = vmatprep.subr.bf16.mxu1 %v2174_v15  ;;  %v2178_v18 = vpack.c.bf16 %v1155_v17, %v1154_v16  ;;  %v1156_v19 = vld [vmem:[#allocation7 + $0x30] sm:$0xff] }
 0x17f   : > { %v568_v23 = vmax.f32 %v466_v22, 0.0  ;;  %v1812_v24 = vpop.f32.mrb[16].mxu0  ;;  %v1159_v22 = vld [vmem:[#allocation7 + $0x48] sm:$0xff] }
 0x180   : > { %v481_v26 = vadd.f32 %v1812_v24, %v2701_v40  ;;  %v475_v27 = vpop.f32.mrb[17].mxu0  ;;  %v1160_v24 = vld [vmem:[#allocation7 + $0x50] sm:$0xff] }
 0x181   : > { %v476_v28 = vadd.f32 %v2701_v40, %v475_v27  ;;  %1887 = vmatprep.mubr.f32.mxu1 %v568_v23  ;;  %2177 = vmatpush3.bf16.msra.mxu1 %v2174_v15  ;;  %v2186_v23 = vpack.c.bf16 %v1159_v22, %v1158_v21  ;;  %v1162_v27 = vld [vmem:[#allocation7 + $0x60] sm:$0xff] }
 0x182   : > { %1888 = vmatmul.mubr.f32.gmra.mrb[14].mxu1 %v569_v25  ;;  %v571_v31 = vmax.f32 %v481_v26, 0.0  ;;  %2179 = vmatprep.subr.bf16.mxu1 %v2178_v18  ;;  %v1161_v25 = vld [vmem:[#allocation7 + $0x58] sm:$0xff] }
 0x183   : > { %v570_v29 = vmax.f32 %v476_v28, 0.0  ;;  %v1815_v30 = vpop.f32.mrb[18].mxu0  ;;  %v2190_v26 = vpack.c.bf16 %v1161_v25, %v1160_v24  ;;  %v1163_v28 = vld [vmem:[#allocation7 + $0x68] sm:$0xff] }
 0x184   : > { %v491_v32 = vadd.f32 %v1815_v30, %v2701_v40  ;;  %v485_v33 = vpop.f32.mrb[19].mxu0  ;;  %v1164_v30 = vld [vmem:[#allocation7 + $0x70] sm:$0xff] }
 0x185   : > { %v486_v34 = vadd.f32 %v2701_v40, %v485_v33  ;;  %1890 = vmatprep.mubr.f32.mxu1 %v570_v29  ;;  %2181 = vmatpush3.bf16.msra.mxu1 %v2178_v18  ;;  %v2194_v29 = vpack.c.bf16 %v1163_v28, %v1162_v27  ;;  %v2738_v33 = vld [vmem:[%s2935_s2 + $0x1] ss:$0 sm:$0xff] }
 0x186   : > { %1891 = vmatmul.mubr.f32.gmra.mrb[16].mxu1 %v571_v31  ;;  %v573_v37 = vmax.f32 %v491_v32, 0.0  ;;  %v1165_v31 = vld [vmem:[#allocation7 + $0x78] sm:$0xff] }
 0x187   : > { %v572_v35 = vmax.f32 %v486_v34, 0.0  ;;  %v1818_v36 = vpop.f32.mrb[20].mxu0  ;;  %v2198_v32 = vpack.c.bf16 %v1165_v31, %v1164_v30 }
 0x188   : > { %v501_v38 = vadd.f32 %v1818_v36, %v2701_v40  ;;  %v495_v39 = vpop.f32.mrb[21].mxu0 }
 0x189   : > { %v496_v41 = vadd.f32 %v2701_v40, %v495_v39  ;;  %1893 = vmatprep.mubr.f32.mxu1 %v572_v35 }
 0x18a   : > { %1894 = vmatmul.mubr.f32.gmra.mrb[18].mxu1 %v573_v37  ;;  %v575_v44 = vmax.f32 %v501_v38, 0.0 }
 0x18b   : > { %v574_v42 = vmax.f32 %v496_v41, 0.0  ;;  %v1821_v43 = vpop.f32.mrb[22].mxu0 }
 0x18c   : > { %v511_v45 = vadd.f32 %v1821_v43, %v2701_v40  ;;  %v505_v46 = vpop.f32.mrb[23].mxu0 }
 0x18d   : > { %v506_v47 = vadd.f32 %v2701_v40, %v505_v46  ;;  %1896 = vmatprep.mubr.f32.mxu1 %v574_v42 }
 0x18e   : > { %1897 = vmatmul.mubr.f32.gmra.mrb[20].mxu1 %v575_v44  ;;  %v577_v50 = vmax.f32 %v511_v45, 0.0 }
 0x18f   : > { %v576_v48 = vmax.f32 %v506_v47, 0.0  ;;  %v1824_v49 = vpop.f32.mrb[24].mxu0 }
 0x190   : > { %v521_v51 = vadd.f32 %v1824_v49, %v2701_v40  ;;  %v515_v52 = vpop.f32.mrb[25].mxu0 }
 0x191   : > { %v516_v53 = vadd.f32 %v2701_v40, %v515_v52  ;;  %1899 = vmatprep.mubr.f32.mxu1 %v576_v48 }
 0x192   : > { %1900 = vmatmul.mubr.f32.gmra.mrb[22].mxu1 %v577_v50  ;;  %v579_v56 = vmax.f32 %v521_v51, 0.0 }
 0x193   : > { %v578_v54 = vmax.f32 %v516_v53, 0.0  ;;  %v1827_v55 = vpop.f32.mrb[26].mxu0 }
 0x194   : > { %v531_v57 = vadd.f32 %v1827_v55, %v2701_v40  ;;  %v525_v58 = vpop.f32.mrb[27].mxu0 }
 0x195   : > { %v526_v59 = vadd.f32 %v2701_v40, %v525_v58  ;;  %1902 = vmatprep.mubr.f32.mxu1 %v578_v54 }
 0x196   : > { %1903 = vmatmul.mubr.f32.gmra.mrb[24].mxu1 %v579_v56  ;;  %v581_v62 = vmax.f32 %v531_v57, 0.0 }
 0x197   : > { %v580_v60 = vmax.f32 %v526_v59, 0.0  ;;  %v1830_v61 = vpop.f32.mrb[28].mxu0 }
 0x198   : > { %v541_v63 = vadd.f32 %v1830_v61, %v2701_v40  ;;  %v535_v0 = vpop.f32.mrb[29].mxu0 }
 0x199   : > { %v536_v1 = vadd.f32 %v2701_v40, %v535_v0  ;;  %1905 = vmatprep.mubr.f32.mxu1 %v580_v60 }
 0x19a   : > { %1906 = vmatmul.mubr.f32.gmra.mrb[26].mxu1 %v581_v62  ;;  %v583_v4 = vmax.f32 %v541_v63, 0.0 }
 0x19b   : > { %v582_v2 = vmax.f32 %v536_v1, 0.0  ;;  %v1833_v3 = vpop.f32.mrb[30].mxu0 }
 0x19c   : > { %v551_v5 = vadd.f32 %v1833_v3, %v2701_v40  ;;  %v545_v6 = vpop.f32.mrb[31].mxu0 }
 0x19d   : > { %v546_v7 = vadd.f32 %v2701_v40, %v545_v6  ;;  %1908 = vmatprep.mubr.f32.mxu1 %v582_v2  ;;  %v1157_v40 = vld [vmem:[#allocation7 + $0x38] sm:$0xff] }
 0x19e   : > { %1909 = vmatmul.mubr.f32.gmra.mrb[28].mxu1 %v583_v4  ;;  %v585_v9 = vmax.f32 %v551_v5, 0.0  ;;  %v2182_v20 = vpack.c.bf16 %v1157_v40, %v1156_v19 }
 0x19f   : > { %v584_v8 = vmax.f32 %v546_v7, 0.0 }
 0x1a0   : > { %2183 = vmatprep.subr.bf16.mxu1 %v2182_v20 }
 0x1a1   : > { %1911 = vmatprep.mubr.f32.mxu1 %v584_v8  ;;  %2185 = vmatpush3.bf16.msra.mxu1 %v2182_v20 }
 0x1a2   : > { %1912 = vmatmul.mubr.f32.gmra.mrb[30].mxu1 %v585_v9  ;;  %2187 = vmatprep.subr.bf16.mxu1 %v2186_v23 }
 0x1a5   : > { %2189 = vmatpush3.bf16.msra.mxu1 %v2186_v23 }
 0x1a6   : > { %2191 = vmatprep.subr.bf16.mxu1 %v2190_v26 }
 0x1a9   : > { %2193 = vmatpush3.bf16.msra.mxu1 %v2190_v26 }
 0x1aa   : > { %2195 = vmatprep.subr.bf16.mxu1 %v2194_v29 }
 0x1ad   : > { %2197 = vmatpush3.bf16.msra.mxu1 %v2194_v29 }
 0x1ae   : > { %2199 = vmatprep.subr.bf16.mxu1 %v2198_v32 }
 0x1b1   : > { %2201 = vmatpush3.bf16.msra.mxu1 %v2198_v32 }
 0x239   : > { %v1868_v34 = vpop.f32.mrb[0].mxu1 }
 0x23a   : > { %v683_v35 = vadd.f32 %v1868_v34, %v2738_v33  ;;  %v677_v36 = vpop.f32.mrb[1].mxu1 }
 0x23b   : > { %v678_v37 = vadd.f32 %v2738_v33, %v677_v36 }
 0x23c   : > { %v837_v41 = vmax.f32 %v683_v35, 0.0 }
 0x23d   : > { %v836_v38 = vmax.f32 %v678_v37, 0.0  ;;  %v1871_v39 = vpop.f32.mrb[2].mxu1 }
 0x23e   : > { %v693_v42 = vadd.f32 %v1871_v39, %v2738_v33  ;;  %v687_v43 = vpop.f32.mrb[3].mxu1 }
 0x23f   : > { %v688_v44 = vadd.f32 %v2738_v33, %v687_v43  ;;  %1946 = vmatprep.mubr.f32.mxu0 %v836_v38 }
 0x240   : > { %1947 = vmatmul.mubr.f32.vlgmr.msra.gmra.mrb[32].mxu0 %v837_v41  ;;  %v839_v47 = vmax.f32 %v693_v42, 0.0 }
 0x241   : > { %v838_v45 = vmax.f32 %v688_v44, 0.0  ;;  %v1874_v46 = vpop.f32.mrb[4].mxu1 }
 0x242   : > { %v703_v48 = vadd.f32 %v1874_v46, %v2738_v33  ;;  %v697_v49 = vpop.f32.mrb[5].mxu1 }
 0x243   : > { %v698_v50 = vadd.f32 %v2738_v33, %v697_v49  ;;  %1949 = vmatprep.mubr.f32.mxu0 %v838_v45 }
 0x244   : > { %1950 = vmatmul.mubr.f32.gmra.mrb[34].mxu0 %v839_v47  ;;  %v841_v53 = vmax.f32 %v703_v48, 0.0 }
 0x245   : > { %v840_v51 = vmax.f32 %v698_v50, 0.0  ;;  %v1877_v52 = vpop.f32.mrb[6].mxu1 }
 0x246   : > { %v713_v54 = vadd.f32 %v1877_v52, %v2738_v33  ;;  %v707_v55 = vpop.f32.mrb[7].mxu1 }
 0x247   : > { %v708_v56 = vadd.f32 %v2738_v33, %v707_v55  ;;  %1952 = vmatprep.mubr.f32.mxu0 %v840_v51 }
 0x248   : > { %1953 = vmatmul.mubr.f32.gmra.mrb[36].mxu0 %v841_v53  ;;  %v843_v59 = vmax.f32 %v713_v54, 0.0 }
 0x249   : > { %v842_v57 = vmax.f32 %v708_v56, 0.0  ;;  %v1880_v58 = vpop.f32.mrb[8].mxu1 }
 0x24a   : > { %v723_v60 = vadd.f32 %v1880_v58, %v2738_v33  ;;  %v717_v61 = vpop.f32.mrb[9].mxu1 }
 0x24b   : > { %v718_v62 = vadd.f32 %v2738_v33, %v717_v61  ;;  %1955 = vmatprep.mubr.f32.mxu0 %v842_v57 }
 0x24c   : > { %1956 = vmatmul.mubr.f32.gmra.mrb[38].mxu0 %v843_v59  ;;  %v845_v1 = vmax.f32 %v723_v60, 0.0 }
 0x24d   : > { %v844_v63 = vmax.f32 %v718_v62, 0.0  ;;  %v1883_v0 = vpop.f32.mrb[10].mxu1 }
 0x24e   : > { %v733_v2 = vadd.f32 %v1883_v0, %v2738_v33  ;;  %v727_v3 = vpop.f32.mrb[11].mxu1 }
 0x24f   : > { %v728_v4 = vadd.f32 %v2738_v33, %v727_v3  ;;  %1958 = vmatprep.mubr.f32.mxu0 %v844_v63 }
 0x250   : > { %1959 = vmatmul.mubr.f32.gmra.mrb[40].mxu0 %v845_v1  ;;  %v847_v7 = vmax.f32 %v733_v2, 0.0 }
 0x251   : > { %v846_v5 = vmax.f32 %v728_v4, 0.0  ;;  %v1886_v6 = vpop.f32.mrb[12].mxu1  ;;  %v2775_v4 = vld [vmem:[%s2935_s2 + $0x2] ss:$0 sm:$0xff] }
 0x252   : > { %v743_v8 = vadd.f32 %v1886_v6, %v2738_v33  ;;  %v737_v9 = vpop.f32.mrb[13].mxu1 }
 0x253   : > { %v738_v10 = vadd.f32 %v2738_v33, %v737_v9  ;;  %1961 = vmatprep.mubr.f32.mxu0 %v846_v5 }
 0x254   : > { %1962 = vmatmul.mubr.f32.gmra.mrb[42].mxu0 %v847_v7  ;;  %v849_v13 = vmax.f32 %v743_v8, 0.0 }
 0x255   : > { %v848_v11 = vmax.f32 %v738_v10, 0.0  ;;  %v1889_v12 = vpop.f32.mrb[14].mxu1 }
 0x256   : > { %v753_v14 = vadd.f32 %v1889_v12, %v2738_v33  ;;  %v747_v15 = vpop.f32.mrb[15].mxu1 }
 0x257   : > { %v748_v16 = vadd.f32 %v2738_v33, %v747_v15  ;;  %1964 = vmatprep.mubr.f32.mxu0 %v848_v11 }
 0x258   : > { %1965 = vmatmul.mubr.f32.gmra.mrb[44].mxu0 %v849_v13  ;;  %v851_v19 = vmax.f32 %v753_v14, 0.0 }
 0x259   : > { %v850_v17 = vmax.f32 %v748_v16, 0.0  ;;  %v1892_v18 = vpop.f32.mrb[16].mxu1 }
 0x25a   : > { %v763_v40 = vadd.f32 %v1892_v18, %v2738_v33  ;;  %v757_v20 = vpop.f32.mrb[17].mxu1 }
 0x25b   : > { %v758_v21 = vadd.f32 %v2738_v33, %v757_v20  ;;  %1967 = vmatprep.mubr.f32.mxu0 %v850_v17 }
 0x25c   : > { %1968 = vmatmul.mubr.f32.gmra.mrb[46].mxu0 %v851_v19  ;;  %v853_v24 = vmax.f32 %v763_v40, 0.0 }
 0x25d   : > { %v852_v22 = vmax.f32 %v758_v21, 0.0  ;;  %v1895_v23 = vpop.f32.mrb[18].mxu1 }
 0x25e   : > { %v773_v25 = vadd.f32 %v1895_v23, %v2738_v33  ;;  %v767_v26 = vpop.f32.mrb[19].mxu1 }
 0x25f   : > { %v768_v27 = vadd.f32 %v2738_v33, %v767_v26  ;;  %1970 = vmatprep.mubr.f32.mxu0 %v852_v22 }
 0x260   : > { %1971 = vmatmul.mubr.f32.gmra.mrb[48].mxu0 %v853_v24  ;;  %v855_v30 = vmax.f32 %v773_v25, 0.0 }
 0x261   : > { %v854_v28 = vmax.f32 %v768_v27, 0.0  ;;  %v1898_v29 = vpop.f32.mrb[20].mxu1 }
 0x262   : > { %v783_v31 = vadd.f32 %v1898_v29, %v2738_v33  ;;  %v777_v32 = vpop.f32.mrb[21].mxu1 }
 0x263   : > { %v778_v34 = vadd.f32 %v2738_v33, %v777_v32  ;;  %1973 = vmatprep.mubr.f32.mxu0 %v854_v28 }
 0x264   : > { %1974 = vmatmul.mubr.f32.gmra.mrb[50].mxu0 %v855_v30  ;;  %v857_v37 = vmax.f32 %v783_v31, 0.0 }
 0x265   : > { %v856_v35 = vmax.f32 %v778_v34, 0.0  ;;  %v1901_v36 = vpop.f32.mrb[22].mxu1 }
 0x266   : > { %v793_v38 = vadd.f32 %v1901_v36, %v2738_v33  ;;  %v787_v39 = vpop.f32.mrb[23].mxu1 }
 0x267   : > { %v788_v41 = vadd.f32 %v2738_v33, %v787_v39  ;;  %1976 = vmatprep.mubr.f32.mxu0 %v856_v35 }
 0x268   : > { %1977 = vmatmul.mubr.f32.gmra.mrb[52].mxu0 %v857_v37  ;;  %v859_v44 = vmax.f32 %v793_v38, 0.0 }
 0x269   : > { %v858_v42 = vmax.f32 %v788_v41, 0.0  ;;  %v1904_v43 = vpop.f32.mrb[24].mxu1 }
 0x26a   : > { %v803_v45 = vadd.f32 %v1904_v43, %v2738_v33  ;;  %v797_v46 = vpop.f32.mrb[25].mxu1 }
 0x26b   : > { %v798_v47 = vadd.f32 %v2738_v33, %v797_v46  ;;  %1979 = vmatprep.mubr.f32.mxu0 %v858_v42 }
 0x26c   : > { %1980 = vmatmul.mubr.f32.gmra.mrb[54].mxu0 %v859_v44  ;;  %v861_v50 = vmax.f32 %v803_v45, 0.0 }
 0x26d   : > { %v860_v48 = vmax.f32 %v798_v47, 0.0  ;;  %v1907_v49 = vpop.f32.mrb[26].mxu1 }
 0x26e   : > { %v813_v51 = vadd.f32 %v1907_v49, %v2738_v33  ;;  %v807_v52 = vpop.f32.mrb[27].mxu1 }
 0x26f   : > { %v808_v53 = vadd.f32 %v2738_v33, %v807_v52  ;;  %1982 = vmatprep.mubr.f32.mxu0 %v860_v48 }
 0x270   : > { %1983 = vmatmul.mubr.f32.gmra.mrb[56].mxu0 %v861_v50  ;;  %v863_v56 = vmax.f32 %v813_v51, 0.0 }
 0x271   : > { %v862_v54 = vmax.f32 %v808_v53, 0.0  ;;  %v1910_v55 = vpop.f32.mrb[28].mxu1 }
 0x272   : > { %v823_v57 = vadd.f32 %v1910_v55, %v2738_v33  ;;  %v817_v58 = vpop.f32.mrb[29].mxu1 }
 0x273   : > { %v818_v59 = vadd.f32 %v2738_v33, %v817_v58  ;;  %1985 = vmatprep.mubr.f32.mxu0 %v862_v54 }
 0x274   : > { %1986 = vmatmul.mubr.f32.gmra.mrb[58].mxu0 %v863_v56  ;;  %v865_v62 = vmax.f32 %v823_v57, 0.0 }
 0x275   : > { %v864_v60 = vmax.f32 %v818_v59, 0.0  ;;  %v1913_v61 = vpop.f32.mrb[30].mxu1 }
 0x276   : > { %v833_v63 = vadd.f32 %v1913_v61, %v2738_v33  ;;  %v827_v0 = vpop.f32.mrb[31].mxu1 }
 0x277   : > { %v828_v1 = vadd.f32 %v2738_v33, %v827_v0  ;;  %1988 = vmatprep.mubr.f32.mxu0 %v864_v60 }
 0x278   : > { %1989 = vmatmul.mubr.f32.gmra.mrb[60].mxu0 %v865_v62  ;;  %v867_v3 = vmax.f32 %v833_v63, 0.0 }
 0x279   : > { %v866_v2 = vmax.f32 %v828_v1, 0.0 }
 0x27b   : > { %1991 = vmatprep.mubr.f32.mxu0 %v866_v2 }
 0x27c   : > { %1992 = vmatmul.mubr.f32.gmra.mrb[62].mxu0 %v867_v3 }
 0x313   : > { %v1948_v5 = vpop.f32.mrb[32].mxu0 }
 0x314   : > { %v965_v6 = vadd.f32 %v1948_v5, %v2775_v4  ;;  %v959_v7 = vpop.f32.mrb[33].mxu0 }
 0x315   : > { %v960_v8 = vadd.f32 %v2775_v4, %v959_v7 }
 0x316   : > { %v1119_v33 = vmax.f32 %v965_v6, 0.0 }
 0x317   : > { %v1118_v9 = vmax.f32 %v960_v8, 0.0  ;;  %v1951_v10 = vpop.f32.mrb[34].mxu0 }
 0x318   : > { %v975_v11 = vadd.f32 %v1951_v10, %v2775_v4  ;;  %v969_v12 = vpop.f32.mrb[35].mxu0 }
 0x319   : > { %v970_v13 = vadd.f32 %v2775_v4, %v969_v12  ;;  %2026 = vmatprep.mubr.f32.mxu1 %v1118_v9 }
 0x31a   : > { %2027 = vmatmul.mubr.f32.vlgmr.msra.gmra.mrb[32].mxu1 %v1119_v33  ;;  %v1121_v16 = vmax.f32 %v975_v11, 0.0 }
 0x31b   : > { %v1120_v14 = vmax.f32 %v970_v13, 0.0  ;;  %v1954_v15 = vpop.f32.mrb[36].mxu0 }
 0x31c   : > { %v985_v17 = vadd.f32 %v1954_v15, %v2775_v4  ;;  %v979_v18 = vpop.f32.mrb[37].mxu0 }
 0x31d   : > { %v980_v19 = vadd.f32 %v2775_v4, %v979_v18  ;;  %2029 = vmatprep.mubr.f32.mxu1 %v1120_v14 }
 0x31e   : > { %2030 = vmatmul.mubr.f32.gmra.mrb[34].mxu1 %v1121_v16  ;;  %v1123_v21 = vmax.f32 %v985_v17, 0.0 }
 0x31f   : > { %v1122_v40 = vmax.f32 %v980_v19, 0.0  ;;  %v1957_v20 = vpop.f32.mrb[38].mxu0 }
 0x320   : > { %v995_v22 = vadd.f32 %v1957_v20, %v2775_v4  ;;  %v989_v23 = vpop.f32.mrb[39].mxu0 }
 0x321   : > { %v990_v24 = vadd.f32 %v2775_v4, %v989_v23  ;;  %2032 = vmatprep.mubr.f32.mxu1 %v1122_v40 }
 0x322   : > { %2033 = vmatmul.mubr.f32.gmra.mrb[36].mxu1 %v1123_v21  ;;  %v1125_v27 = vmax.f32 %v995_v22, 0.0 }
 0x323   : > { %v1124_v25 = vmax.f32 %v990_v24, 0.0  ;;  %v1960_v26 = vpop.f32.mrb[40].mxu0 }
 0x324   : > { %v1005_v28 = vadd.f32 %v1960_v26, %v2775_v4  ;;  %v999_v29 = vpop.f32.mrb[41].mxu0 }
 0x325   : > { %v1000_v30 = vadd.f32 %v2775_v4, %v999_v29  ;;  %2035 = vmatprep.mubr.f32.mxu1 %v1124_v25 }
 0x326   : > { %2036 = vmatmul.mubr.f32.gmra.mrb[38].mxu1 %v1125_v27  ;;  %v1127_v34 = vmax.f32 %v1005_v28, 0.0 }
 0x327   : > { %v1126_v31 = vmax.f32 %v1000_v30, 0.0  ;;  %v1963_v32 = vpop.f32.mrb[42].mxu0 }
 0x328   : > { %v1015_v35 = vadd.f32 %v1963_v32, %v2775_v4  ;;  %v1009_v36 = vpop.f32.mrb[43].mxu0 }
 0x329   : > { %v1010_v37 = vadd.f32 %v2775_v4, %v1009_v36  ;;  %2038 = vmatprep.mubr.f32.mxu1 %v1126_v31 }
 0x32a   : > { %2039 = vmatmul.mubr.f32.gmra.mrb[40].mxu1 %v1127_v34  ;;  %v1129_v41 = vmax.f32 %v1015_v35, 0.0 }
 0x32b   : > { %v1128_v38 = vmax.f32 %v1010_v37, 0.0  ;;  %v1966_v39 = vpop.f32.mrb[44].mxu0  ;;  %v2812_v37 = vld [vmem:[%s2937_s4] ss:$0 sm:$0xff] }
 0x32c   : > { %v1025_v42 = vadd.f32 %v1966_v39, %v2775_v4  ;;  %v1019_v43 = vpop.f32.mrb[45].mxu0 }
 0x32d   : > { %v1020_v44 = vadd.f32 %v2775_v4, %v1019_v43  ;;  %2041 = vmatprep.mubr.f32.mxu1 %v1128_v38 }
 0x32e   : > { %2042 = vmatmul.mubr.f32.gmra.mrb[42].mxu1 %v1129_v41  ;;  %v1131_v47 = vmax.f32 %v1025_v42, 0.0 }
 0x32f   : > { %v1130_v45 = vmax.f32 %v1020_v44, 0.0  ;;  %v1969_v46 = vpop.f32.mrb[46].mxu0 }
 0x330   : > { %v1035_v48 = vadd.f32 %v1969_v46, %v2775_v4  ;;  %v1029_v49 = vpop.f32.mrb[47].mxu0 }
 0x331   : > { %v1030_v50 = vadd.f32 %v2775_v4, %v1029_v49  ;;  %2044 = vmatprep.mubr.f32.mxu1 %v1130_v45 }
 0x332   : > { %2045 = vmatmul.mubr.f32.gmra.mrb[44].mxu1 %v1131_v47  ;;  %v1133_v53 = vmax.f32 %v1035_v48, 0.0 }
 0x333   : > { %v1132_v51 = vmax.f32 %v1030_v50, 0.0  ;;  %v1972_v52 = vpop.f32.mrb[48].mxu0 }
 0x334   : > { %v1045_v54 = vadd.f32 %v1972_v52, %v2775_v4  ;;  %v1039_v55 = vpop.f32.mrb[49].mxu0 }
 0x335   : > { %v1040_v56 = vadd.f32 %v2775_v4, %v1039_v55  ;;  %2047 = vmatprep.mubr.f32.mxu1 %v1132_v51 }
 0x336   : > { %2048 = vmatmul.mubr.f32.gmra.mrb[46].mxu1 %v1133_v53  ;;  %v1135_v59 = vmax.f32 %v1045_v54, 0.0 }
 0x337   : > { %v1134_v57 = vmax.f32 %v1040_v56, 0.0  ;;  %v1975_v58 = vpop.f32.mrb[50].mxu0 }
 0x338   : > { %v1055_v60 = vadd.f32 %v1975_v58, %v2775_v4  ;;  %v1049_v61 = vpop.f32.mrb[51].mxu0 }
 0x339   : > { %v1050_v62 = vadd.f32 %v2775_v4, %v1049_v61  ;;  %2050 = vmatprep.mubr.f32.mxu1 %v1134_v57 }
 0x33a   : > { %2051 = vmatmul.mubr.f32.gmra.mrb[48].mxu1 %v1135_v59  ;;  %v1137_v1 = vmax.f32 %v1055_v60, 0.0 }
 0x33b   : > { %v1136_v63 = vmax.f32 %v1050_v62, 0.0  ;;  %v1978_v0 = vpop.f32.mrb[52].mxu0 }
 0x33c   : > { %v1065_v2 = vadd.f32 %v1978_v0, %v2775_v4  ;;  %v1059_v3 = vpop.f32.mrb[53].mxu0 }
 0x33d   : > { %v1060_v5 = vadd.f32 %v2775_v4, %v1059_v3  ;;  %2053 = vmatprep.mubr.f32.mxu1 %v1136_v63 }
 0x33e   : > { %2054 = vmatmul.mubr.f32.gmra.mrb[50].mxu1 %v1137_v1  ;;  %v1139_v8 = vmax.f32 %v1065_v2, 0.0 }
 0x33f   : > { %v1138_v6 = vmax.f32 %v1060_v5, 0.0  ;;  %v1981_v7 = vpop.f32.mrb[54].mxu0 }
 0x340   : > { %v1075_v9 = vadd.f32 %v1981_v7, %v2775_v4  ;;  %v1069_v10 = vpop.f32.mrb[55].mxu0 }
 0x341   : > { %v1070_v33 = vadd.f32 %v2775_v4, %v1069_v10  ;;  %2056 = vmatprep.mubr.f32.mxu1 %v1138_v6 }
 0x342   : > { %2057 = vmatmul.mubr.f32.gmra.mrb[52].mxu1 %v1139_v8  ;;  %v1141_v13 = vmax.f32 %v1075_v9, 0.0 }
 0x343   : > { %v1140_v11 = vmax.f32 %v1070_v33, 0.0  ;;  %v1984_v12 = vpop.f32.mrb[56].mxu0 }
 0x344   : > { %v1085_v14 = vadd.f32 %v1984_v12, %v2775_v4  ;;  %v1079_v15 = vpop.f32.mrb[57].mxu0 }
 0x345   : > { %v1080_v16 = vadd.f32 %v2775_v4, %v1079_v15  ;;  %2059 = vmatprep.mubr.f32.mxu1 %v1140_v11 }
 0x346   : > { %2060 = vmatmul.mubr.f32.gmra.mrb[54].mxu1 %v1141_v13  ;;  %v1143_v19 = vmax.f32 %v1085_v14, 0.0 }
 0x347   : > { %v1142_v17 = vmax.f32 %v1080_v16, 0.0  ;;  %v1987_v18 = vpop.f32.mrb[58].mxu0 }
 0x348   : > { %v1095_v40 = vadd.f32 %v1987_v18, %v2775_v4  ;;  %v1089_v20 = vpop.f32.mrb[59].mxu0 }
 0x349   : > { %v1090_v21 = vadd.f32 %v2775_v4, %v1089_v20  ;;  %2062 = vmatprep.mubr.f32.mxu1 %v1142_v17 }
 0x34a   : > { %2063 = vmatmul.mubr.f32.gmra.mrb[56].mxu1 %v1143_v19  ;;  %v1145_v24 = vmax.f32 %v1095_v40, 0.0 }
 0x34b   : > { %v1144_v22 = vmax.f32 %v1090_v21, 0.0  ;;  %v1990_v23 = vpop.f32.mrb[60].mxu0 }
 0x34c   : > { %v1105_v25 = vadd.f32 %v1990_v23, %v2775_v4  ;;  %v1099_v26 = vpop.f32.mrb[61].mxu0 }
 0x34d   : > { %v1100_v27 = vadd.f32 %v2775_v4, %v1099_v26  ;;  %2065 = vmatprep.mubr.f32.mxu1 %v1144_v22 }
 0x34e   : > { %2066 = vmatmul.mubr.f32.gmra.mrb[58].mxu1 %v1145_v24  ;;  %v1147_v30 = vmax.f32 %v1105_v25, 0.0 }
 0x34f   : > { %v1146_v28 = vmax.f32 %v1100_v27, 0.0  ;;  %v1993_v29 = vpop.f32.mrb[62].mxu0 }
 0x350   : > { %v1115_v31 = vadd.f32 %v1993_v29, %v2775_v4  ;;  %v1109_v32 = vpop.f32.mrb[63].mxu0 }
 0x351   : > { %v1110_v34 = vadd.f32 %v2775_v4, %v1109_v32  ;;  %2068 = vmatprep.mubr.f32.mxu1 %v1146_v28 }
 0x352   : > { %2069 = vmatmul.mubr.f32.gmra.mrb[60].mxu1 %v1147_v30  ;;  %v1149_v36 = vmax.f32 %v1115_v31, 0.0 }
 0x353   : > { %v1148_v35 = vmax.f32 %v1110_v34, 0.0 }
 0x355   : > { %2071 = vmatprep.mubr.f32.mxu1 %v1148_v35 }
 0x356   : > { %2072 = vmatmul.mubr.f32.gmra.mrb[62].mxu1 %v1149_v36 }
 0x3ed   : > { %v2028_v38 = vpop.f32.mrb[32].mxu1 }
 0x3ee   : > { %v1245_v39 = vadd.f32 %v2028_v38, %v2812_v37  ;;  %v1239_v41 = vpop.f32.mrb[33].mxu1 }
 0x3ef   : > { %v1240_v42 = vadd.f32 %v2812_v37, %v1239_v41 }
 0x3f0   : > { %1399 = vst [vmem:[%s2818_s30 + $0x8] sm:$0xff] %v1245_v39 }
 0x3f1   : > { %1398 = vst [vmem:[%s2818_s30] sm:$0xff] %v1240_v42  ;;  %v2031_v4 = vpop.f32.mrb[34].mxu1 }
 0x3f2   : > { %v1255_v43 = vadd.f32 %v2031_v4, %v2812_v37  ;;  %v1249_v44 = vpop.f32.mrb[35].mxu1 }
 0x3f3   : > { %v1250_v45 = vadd.f32 %v2812_v37, %v1249_v44 }
 0x3f4   : > { %1401 = vst [vmem:[%s2818_s30 + $0x18] sm:$0xff] %v1255_v43 }
 0x3f5   : > { %1400 = vst [vmem:[%s2818_s30 + $0x10] sm:$0xff] %v1250_v45  ;;  %v2034_v46 = vpop.f32.mrb[36].mxu1 }
 0x3f6   : > { %v1265_v47 = vadd.f32 %v2034_v46, %v2812_v37  ;;  %v1259_v48 = vpop.f32.mrb[37].mxu1 }
 0x3f7   : > { %v1260_v49 = vadd.f32 %v2812_v37, %v1259_v48 }
 0x3f8   : > { %1403 = vst [vmem:[%s2818_s30 + $0x28] sm:$0xff] %v1265_v47 }
 0x3f9   : > { %1402 = vst [vmem:[%s2818_s30 + $0x20] sm:$0xff] %v1260_v49  ;;  %v2037_v50 = vpop.f32.mrb[38].mxu1 }
 0x3fa   : > { %v1275_v51 = vadd.f32 %v2037_v50, %v2812_v37  ;;  %v1269_v52 = vpop.f32.mrb[39].mxu1 }
 0x3fb   : > { %v1270_v53 = vadd.f32 %v2812_v37, %v1269_v52 }
 0x3fc   : > { %1405 = vst [vmem:[%s2818_s30 + $0x38] sm:$0xff] %v1275_v51 }
 0x3fd   : > { %1404 = vst [vmem:[%s2818_s30 + $0x30] sm:$0xff] %v1270_v53  ;;  %v2040_v54 = vpop.f32.mrb[40].mxu1 }
 0x3fe   : > { %v1285_v55 = vadd.f32 %v2040_v54, %v2812_v37  ;;  %v1279_v56 = vpop.f32.mrb[41].mxu1 }
 0x3ff   : > { %v1280_v57 = vadd.f32 %v2812_v37, %v1279_v56 }
 0x400   : > { %1407 = vst [vmem:[%s2818_s30 + $0x48] sm:$0xff] %v1285_v55 }
 0x401   : > { %1406 = vst [vmem:[%s2818_s30 + $0x40] sm:$0xff] %v1280_v57  ;;  %v2043_v58 = vpop.f32.mrb[42].mxu1 }
 0x402   : > { %v1295_v59 = vadd.f32 %v2043_v58, %v2812_v37  ;;  %v1289_v60 = vpop.f32.mrb[43].mxu1 }
 0x403   : > { %v1290_v61 = vadd.f32 %v2812_v37, %v1289_v60 }
 0x404   : > { %1409 = vst [vmem:[%s2818_s30 + $0x58] sm:$0xff] %v1295_v59 }
 0x405   : > { %1408 = vst [vmem:[%s2818_s30 + $0x50] sm:$0xff] %v1290_v61  ;;  %v2046_v62 = vpop.f32.mrb[44].mxu1 }
 0x406   : > { %v1305_v63 = vadd.f32 %v2046_v62, %v2812_v37  ;;  %v1299_v0 = vpop.f32.mrb[45].mxu1 }
 0x407   : > { %v1300_v1 = vadd.f32 %v2812_v37, %v1299_v0 }
 0x408   : > { %1411 = vst [vmem:[%s2818_s30 + $0x68] sm:$0xff] %v1305_v63 }
 0x409   : > { %1410 = vst [vmem:[%s2818_s30 + $0x60] sm:$0xff] %v1300_v1  ;;  %v2049_v2 = vpop.f32.mrb[46].mxu1 }
 0x40a   : > { %v1315_v3 = vadd.f32 %v2049_v2, %v2812_v37  ;;  %v1309_v5 = vpop.f32.mrb[47].mxu1 }
 0x40b   : > { %v1310_v6 = vadd.f32 %v2812_v37, %v1309_v5 }
 0x40c   : > { %1413 = vst [vmem:[%s2818_s30 + $0x78] sm:$0xff] %v1315_v3 }
 0x40d   : > { %1412 = vst [vmem:[%s2818_s30 + $0x70] sm:$0xff] %v1310_v6  ;;  %v2052_v7 = vpop.f32.mrb[48].mxu1 }
 0x40e   : > { %v1325_v8 = vadd.f32 %v2052_v7, %v2812_v37  ;;  %v1319_v9 = vpop.f32.mrb[49].mxu1 }
 0x40f   : > { %v1320_v10 = vadd.f32 %v2812_v37, %v1319_v9 }
 0x410   : > { %1415 = vst [vmem:[%s2818_s30 + $0x88] sm:$0xff] %v1325_v8 }
 0x411   : > { %1414 = vst [vmem:[%s2818_s30 + $0x80] sm:$0xff] %v1320_v10  ;;  %v2055_v33 = vpop.f32.mrb[50].mxu1 }
 0x412   : > { %v1335_v11 = vadd.f32 %v2055_v33, %v2812_v37  ;;  %v1329_v12 = vpop.f32.mrb[51].mxu1 }
 0x413   : > { %v1330_v13 = vadd.f32 %v2812_v37, %v1329_v12 }
 0x414   : > { %1417 = vst [vmem:[%s2818_s30 + $0x98] sm:$0xff] %v1335_v11 }
 0x415   : > { %1416 = vst [vmem:[%s2818_s30 + $0x90] sm:$0xff] %v1330_v13  ;;  %v2058_v14 = vpop.f32.mrb[52].mxu1 }
 0x416   : > { %v1345_v15 = vadd.f32 %v2058_v14, %v2812_v37  ;;  %v1339_v16 = vpop.f32.mrb[53].mxu1 }
 0x417   : > { %v1340_v17 = vadd.f32 %v2812_v37, %v1339_v16 }
 0x418   : > { %1419 = vst [vmem:[%s2818_s30 + $0xa8] sm:$0xff] %v1345_v15 }
 0x419   : > { %1418 = vst [vmem:[%s2818_s30 + $0xa0] sm:$0xff] %v1340_v17  ;;  %v2061_v18 = vpop.f32.mrb[54].mxu1 }
 0x41a   : > { %v1355_v19 = vadd.f32 %v2061_v18, %v2812_v37  ;;  %v1349_v40 = vpop.f32.mrb[55].mxu1 }
 0x41b   : > { %v1350_v20 = vadd.f32 %v2812_v37, %v1349_v40 }
 0x41c   : > { %1421 = vst [vmem:[%s2818_s30 + $0xb8] sm:$0xff] %v1355_v19 }
 0x41d   : > { %1420 = vst [vmem:[%s2818_s30 + $0xb0] sm:$0xff] %v1350_v20  ;;  %v2064_v21 = vpop.f32.mrb[56].mxu1 }
 0x41e   : > { %v1365_v22 = vadd.f32 %v2064_v21, %v2812_v37  ;;  %v1359_v23 = vpop.f32.mrb[57].mxu1 }
 0x41f   : > { %v1360_v24 = vadd.f32 %v2812_v37, %v1359_v23 }
 0x420   : > { %1423 = vst [vmem:[%s2818_s30 + $0xc8] sm:$0xff] %v1365_v22 }
 0x421   : > { %1422 = vst [vmem:[%s2818_s30 + $0xc0] sm:$0xff] %v1360_v24  ;;  %v2067_v25 = vpop.f32.mrb[58].mxu1 }
 0x422   : > { %v1375_v26 = vadd.f32 %v2067_v25, %v2812_v37  ;;  %v1369_v27 = vpop.f32.mrb[59].mxu1 }
 0x423   : > { %v1370_v28 = vadd.f32 %v2812_v37, %v1369_v27 }
 0x424   : > { %1425 = vst [vmem:[%s2818_s30 + $0xd8] sm:$0xff] %v1375_v26 }
 0x425   : > { %1424 = vst [vmem:[%s2818_s30 + $0xd0] sm:$0xff] %v1370_v28  ;;  %v2070_v29 = vpop.f32.mrb[60].mxu1 }
 0x426   : > { %v1385_v30 = vadd.f32 %v2070_v29, %v2812_v37  ;;  %v1379_v31 = vpop.f32.mrb[61].mxu1 }
 0x427   : > { %v1380_v32 = vadd.f32 %v2812_v37, %v1379_v31 }
 0x428   : > { %1427 = vst [vmem:[%s2818_s30 + $0xe8] sm:$0xff] %v1385_v30 }
 0x429   : > { %1426 = vst [vmem:[%s2818_s30 + $0xe0] sm:$0xff] %v1380_v32  ;;  %v2073_v34 = vpop.f32.mrb[62].mxu1 }
 0x42a   : > { %v1395_v35 = vadd.f32 %v2073_v34, %v2812_v37  ;;  %v1389_v36 = vpop.f32.mrb[63].mxu1 }
 0x42b   : > { %v1390_v38 = vadd.f32 %v2812_v37, %v1389_v36 }
 0x42c   : > { %1429 = vst [vmem:[%s2818_s30 + $0xf8] sm:$0xff] %v1395_v35 }
 0x42d   : > { %1428 = vst [vmem:[%s2818_s30 + $0xf0] sm:$0xff] %v1390_v38 }
 0x42e   : > { %2372 = shalt.err (!%p2369_p1)
}
 0x42f   : > { %s2373_s16 = scalar_lea.hbm %s2884_s8, 4096  ;;  %s2377_s13 = scalar_lea.hbm %s2938_s5, 8192 }
 0x430   : > { %p2374_p13 = scmp.ne.s32.totalorder %s2884_s8, %s2373_s16  ;;  %p2378_p4 = scmp.lt.u32.totalorder %s2884_s8, %s2938_s5 }
 0x431   : > { %p2379_p5 = scmp.lt.u32.totalorder %s2377_s13, %s2373_s16  ;;  %p2381_p11 = scmp.lt.u32.totalorder %s2373_s16, %s2884_s8 }
 0x432   : > { %p2375_p6 = pnand %p2374_p13, %p2952_p0 }
 0x433   : > { %p2380_p8 = por %p2379_p5, %p2378_p4 }
 0x434   : > { %p2376_p10 = pneg %p2375_p6 }
 0x435   : > { %p2382_p2 = por %p2381_p11, %p2380_p8 }
 0x437   : > { %p2383_p3 = pnand %p2382_p2, %p2376_p10 }
 0x439   : > { %2386 = shalt.err (!%p2383_p3)
}
 0x43a   : > { %s2437_s11 = smov 128   ;;  %s2438_s7 = smov 8  }
 0x43b   : > { %2212 = dma.vmem_to_hbm [thread:$0]  (%p2952_p0), %s2886_s17, 4096, %s2884_s8, %s1431_s22, %s2437_s11, %s2437_s11, %s2438_s7  }
 0x43c PF: > { %s1459_s6 = sand.u32 1, %s2417_s18   ;;  %p2953_p7 = scmp.ne.s32.totalorder %s2943_s25, 0 }
 0x43d   : > { %p2954_p9 = scmp.ge.s32.totalorder %s2429_s21, 2  ;;  %s1460_s12 = scalar_lea.sflag [#allocation4], %s1459_s6 }
 0x43f   : > { %p2226_p12 = pnand %p2954_p9, %p2953_p7 }
 0x441   : > { %2412 = dma.done.wait (!%p2226_p12), %s1460_s12, 4096  }
 0x442   : > { %2414 = vsyncadd (!%p2226_p12), %s1460_s12, 4294963200  ;;  %p19_p1 = scmp.ge.s32.totalorder %s2585_s29, 4   ;;  %s2955_s18 = smov %s2421_s19 }
 0x443   : > { %s2956_s19 = smov %s2425_s20  ;;  %s2957_s20 = smov %s2601_s27 }
 0x444   : > { %s2958_s21 = smov %s2585_s29  ;;  %21 = sbr.rel (!%p19_p1) target bundleno = 6 (0x6), region = 97 }
 0x44b   :  { %1465 = vsyncpa [#allocation3], 1 }
 0x44c   :  { %1467 = vsyncpa [#allocation3 + $0x1], 1 }
 0x44d   :  { %1468 = vsyncpa [#allocation6], 1 }
 0x44e   :  { %1469 = vsyncpa [#allocation4], 1 }
 0x44f   :  { %1471 = vsyncpa [#allocation4 + $0x1], 1 }

</bundles_post_ra>
